<compile_context>
chip_gen: v7x
topology: tpu7x:2x2x1
jax: 0.10.0
libtpu: 0.0.40
codegen_flags: <defaults>
</compile_context>

<pallas_src>
import jax
import jax.numpy as jnp
from jax import lax
from jax.experimental import pallas as pl
from jax.experimental.pallas import tpu as pltpu

# ---- config (Bottle2neck(inplanes=32, planes=32, kernel_size=3, dilation=2, scale=8)) ----
B = 2
INPLANES = 32
PLANES = 32
T = 16
BT = B * T                                # 32 (batch stacked on the time/lane axis)
K = 3
DIL = 2
SCALE = 8
WIDTH = PLANES // SCALE                   # 4
WS = WIDTH * SCALE                        # 32
NUMS = SCALE - 1                          # 7
PAD = (K // 2) * DIL                      # 2
SE_BN = 128
EPS = 1e-5

# ---- single packed parameter slab: (R_TOTAL, 128) f32, row offsets 8-aligned ----
R_W1 = 0                                  # (WS, INPLANES)        cols [0:32]
R_W3 = R_W1 + WS                          # (PLANES, WS)          cols [0:32]
R_SEW1 = R_W3 + PLANES                    # (SE_BN, PLANES)       cols [0:32]
R_SEW2 = R_SEW1 + SE_BN                   # (PLANES, SE_BN)       cols [0:128]
R_WK = R_SEW2 + PLANES                    # branch i: rows [R_WK+4i : R_WK+4i+4], cols [0:12]
R_VEC = R_WK + 32                         # 32-row block of column-packed vectors
R_SEB1 = R_VEC + 32                       # se_b1 (128 values) in col 0
R_TOTAL = R_SEB1 + SE_BN                  # 416

# columns inside the R_VEC block (each parameter vector stored as a (len,1) column)
C_B1, C_S1, C_T1 = 0, 1, 2                # conv1 bias, bn1 folded scale/shift   (32 rows)
C_B3, C_S3, C_T3 = 3, 4, 5                # conv3 bias, bn3 folded scale/shift   (32 rows)
C_SEB2 = 6                                # SE second conv bias                  (32 rows)
C_BK, C_SK, C_TK = 8, 9, 10               # branch bias / folded-BN scale / shift, branch i at rows [4i:4i+4]


# ---------------------------------------------------------------------------
# Pallas kernel: full Bottle2neck forward for the whole (fused) batch
# ---------------------------------------------------------------------------
def bottle2neck_kernel(x_ref, w_ref, o_ref):
    # Stack batch along lanes: X[c, b*T + t] = x[b, c, t]  -> (INPLANES, BT)
    X = jnp.concatenate([x_ref[b] for b in range(B)], axis=1)

    # conv1 (1x1) + bias -> ReLU -> BN1 (folded): one (WS,INPLANES)@(INPLANES,BT) matmul
    h = jnp.dot(w_ref[R_W1:R_W1 + WS, 0:INPLANES], X,
                preferred_element_type=jnp.float32)
    h = jnp.maximum(h + w_ref[R_VEC:R_VEC + WS, C_B1:C_B1 + 1], 0.0)
    h = h * w_ref[R_VEC:R_VEC + WS, C_S1:C_S1 + 1] + w_ref[R_VEC:R_VEC + WS, C_T1:C_T1 + 1]

    # Loop-invariant lane masks (hoisted): implement the dilated conv's "same"
    # zero padding and keep the rolled taps from leaking across the batch
    # boundary (batches share the lane axis).
    tpos = lax.broadcasted_iota(jnp.int32, (WIDTH, BT), 1) % T
    mask_lo = (tpos >= DIL).astype(jnp.float32)          # validity of tap x[t - DIL]
    mask_hi = (tpos < T - DIL).astype(jnp.float32)       # validity of tap x[t + DIL]

    # res2net branches: taps built in registers (pltpu.roll -> XLU) and fused
    # into ONE (WIDTH, K*WIDTH) @ (K*WIDTH, BT) matmul per branch.
    # pltpu.roll matches jnp.roll: out[..., c] = in[..., c - shift]; the +DIL
    # roll is expressed as the positive modular shift BT - DIL.
    chunks = []
    sp = None
    for i in range(NUMS):
        spx_i = h[i * WIDTH:(i + 1) * WIDTH, :]                           # (WIDTH, BT)
        sp = spx_i if i == 0 else sp + spx_i
        z = jnp.concatenate([
            pltpu.roll(sp, DIL, 1) * mask_lo,                             # tap j=0: x[t-DIL]
            sp,                                                           # tap j=1: x[t]
            pltpu.roll(sp, BT - DIL, 1) * mask_hi,                        # tap j=2: x[t+DIL]
        ], axis=0)                                                        # (K*WIDTH, BT)
        y = jnp.dot(w_ref[R_WK + i * WIDTH:R_WK + (i + 1) * WIDTH, 0:K * WIDTH], z,
                    preferred_element_type=jnp.float32)                   # (WIDTH, BT)
        r0 = R_VEC + i * WIDTH
        y = jnp.maximum(y + w_ref[r0:r0 + WIDTH, C_BK:C_BK + 1], 0.0)     # bias + ReLU
        y = y * w_ref[r0:r0 + WIDTH, C_SK:C_SK + 1] + w_ref[r0:r0 + WIDTH, C_TK:C_TK + 1]  # BN_i
        sp = y                                                            # carried to next branch
        chunks.append(y)
    chunks.append(h[NUMS * WIDTH:WS, :])                                  # last split passes through
    cat = jnp.concatenate(chunks, axis=0)                                 # (WS, BT)

    # conv3 (1x1) + bias -> ReLU -> BN3 (folded)
    h3 = jnp.dot(w_ref[R_W3:R_W3 + PLANES, 0:WS], cat,
                 preferred_element_type=jnp.float32)
    h3 = jnp.maximum(h3 + w_ref[R_VEC:R_VEC + PLANES, C_B3:C_B3 + 1], 0.0)
    h3 = h3 * w_ref[R_VEC:R_VEC + PLANES, C_S3:C_S3 + 1] + w_ref[R_VEC:R_VEC + PLANES, C_T3:C_T3 + 1]

    # SE: per-batch mean over its OWN T lanes, 1x1 conv -> ReLU -> 1x1 conv -> sigmoid
    m = jnp.concatenate(
        [jnp.mean(h3[:, b * T:(b + 1) * T], axis=1, keepdims=True) for b in range(B)],
        axis=1)                                                           # (PLANES, B)
    zse = jnp.dot(w_ref[R_SEW1:R_SEW1 + SE_BN, 0:PLANES], m,
                  preferred_element_type=jnp.float32)                     # (SE_BN, B)
    zse = jnp.maximum(zse + w_ref[R_SEB1:R_SEB1 + SE_BN, 0:1], 0.0)
    g = jnp.dot(w_ref[R_SEW2:R_SEW2 + PLANES, 0:SE_BN], zse,
                preferred_element_type=jnp.float32)                       # (PLANES, B)
    g = jax.nn.sigmoid(g + w_ref[R_VEC:R_VEC + PLANES, C_SEB2:C_SEB2 + 1])

    # gate + residual (inplanes == planes); emit NCT directly (no transposes)
    for b in range(B):
        o_ref[b] = h3[:, b * T:(b + 1) * T] * g[:, b:b + 1] + X[:, b * T:(b + 1) * T]


# ---------------------------------------------------------------------------
# Wrapper: one kernel invocation, 2 operands (x + packed parameter slab)
# ---------------------------------------------------------------------------
def bottle2neck_pallas(x_nct, slab):
    # No grid -> whole arrays mapped straight into VMEM (total < 250 KB, huge
    # headroom even on v7x's 64 MiB), no per-step overhead, nothing to
    # double-buffer, input and output stay in the PyTorch NCT layout.
    return pl.pallas_call(
        bottle2neck_kernel,
        out_shape=jax.ShapeDtypeStruct((B, PLANES, T), jnp.float32),
    )(x_nct.astype(jnp.float32), slab)


# ---------------------------------------------------------------------------
# Deterministic parameter init (PyTorch __init__ shapes) + BN folding + packing
# ---------------------------------------------------------------------------
def bn_init(key, n):
    k1, k2, k3, k4 = jax.random.split(key, 4)
    gamma = 1.0 + 0.1 * jax.random.normal(k1, (n,), jnp.float32)
    beta = 0.1 * jax.random.normal(k2, (n,), jnp.float32)
    mean = 0.1 * jax.random.normal(k3, (n,), jnp.float32)
    var = 1.0 + 0.1 * jnp.abs(jax.random.normal(k4, (n,), jnp.float32))
    return (gamma, beta, mean, var)


def init_params(key):
    keys = jax.random.split(key, 64)
    it = iter(keys)
    nrm = lambda shape, s=0.1: s * jax.random.normal(next(it), shape, jnp.float32)
    p = {}
    p['conv1_w'] = nrm((WS, INPLANES, 1))
    p['conv1_b'] = nrm((WS,))
    p['bn1'] = bn_init(next(it), WS)
    p['convs_w'] = [nrm((WIDTH, WIDTH, K)) for _ in range(NUMS)]
    p['convs_b'] = [nrm((WIDTH,)) for _ in range(NUMS)]
    p['bns'] = [bn_init(next(it), WIDTH) for _ in range(NUMS)]
    p['conv3_w'] = nrm((PLANES, WS, 1))
    p['conv3_b'] = nrm((PLANES,))
    p['bn3'] = bn_init(next(it), PLANES)
    p['se_w1'] = nrm((SE_BN, PLANES, 1))
    p['se_b1'] = nrm((SE_BN,))
    p['se_w2'] = nrm((PLANES, SE_BN, 1))
    p['se_b2'] = nrm((PLANES,))
    return p


def fold_bn(bn):
    g, bta, m, v = bn
    s = g / jnp.sqrt(v + EPS)
    return s, bta - m * s


def make_kernel_params(p):
    s1, t1 = fold_bn(p['bn1'])
    s3, t3 = fold_bn(p['bn3'])
    sk_tk = [fold_bn(bn) for bn in p['bns']]

    slab = jnp.zeros((R_TOTAL, 128), jnp.float32)

    def put(sl, r0, c0, blk):
        blk = jnp.asarray(blk, jnp.float32)
        return sl.at[r0:r0 + blk.shape[0], c0:c0 + blk.shape[1]].set(blk)

    col = lambda v: jnp.asarray(v, jnp.float32).reshape(-1, 1)

    slab = put(slab, R_W1, 0, p['conv1_w'][:, :, 0])           # (WS, INPLANES)
    slab = put(slab, R_W3, 0, p['conv3_w'][:, :, 0])           # (PLANES, WS)
    slab = put(slab, R_SEW1, 0, p['se_w1'][:, :, 0])           # (SE_BN, PLANES)
    slab = put(slab, R_SEW2, 0, p['se_w2'][:, :, 0])           # (PLANES, SE_BN)
    for i in range(NUMS):
        # wk_i[cout, j*WIDTH + cin] = convs_w[i][cout, cin, j]   (fused tap layout)
        wk_i = jnp.transpose(p['convs_w'][i], (0, 2, 1)).reshape(WIDTH, K * WIDTH)
        slab = put(slab, R_WK + i * WIDTH, 0, wk_i)

    slab = put(slab, R_VEC, C_B1, col(p['conv1_b']))
    slab = put(slab, R_VEC, C_S1, col(s1))
    slab = put(slab, R_VEC, C_T1, col(t1))
    slab = put(slab, R_VEC, C_B3, col(p['conv3_b']))
    slab = put(slab, R_VEC, C_S3, col(s3))
    slab = put(slab, R_VEC, C_T3, col(t3))
    slab = put(slab, R_VEC, C_SEB2, col(p['se_b2']))
    slab = put(slab, R_VEC, C_BK, col(jnp.concatenate(p['convs_b'])))
    slab = put(slab, R_VEC, C_SK, col(jnp.concatenate([s for s, _ in sk_tk])))
    slab = put(slab, R_VEC, C_TK, col(jnp.concatenate([t for _, t in sk_tk])))
    slab = put(slab, R_SEB1, 0, col(p['se_b1']))
    return slab


# ---------------------------------------------------------------------------
# Pure-JAX reference (mirrors the PyTorch forward, BN in eval mode)
# ---------------------------------------------------------------------------
def conv1d_ref(x, w, b, dilation=1, padding=0):
    y = lax.conv_general_dilated(x, w, (1,), [(padding, padding)],
                                 rhs_dilation=(dilation,),
                                 dimension_numbers=('NCH', 'OIH', 'NCH'))
    return y + b[None, :, None]


def bn_ref(x, bn):
    g, bta, m, v = bn
    return g[None, :, None] * (x - m[None, :, None]) / jnp.sqrt(v[None, :, None] + EPS) \
        + bta[None, :, None]


def ref_forward(x, p):
    residual = x
    out = conv1d_ref(x, p['conv1_w'], p['conv1_b'])
    out = jnp.maximum(out, 0.0)
    out = bn_ref(out, p['bn1'])
    spx = [out[:, i * WIDTH:(i + 1) * WIDTH, :] for i in range(SCALE)]
    outs = []
    sp = None
    for i in range(NUMS):
        sp = spx[i] if i == 0 else sp + spx[i]
        sp = conv1d_ref(sp, p['convs_w'][i], p['convs_b'][i], dilation=DIL, padding=PAD)
        sp = jnp.maximum(sp, 0.0)
        sp = bn_ref(sp, p['bns'][i])
        outs.append(sp)
    outs.append(spx[NUMS])
    out = jnp.concatenate(outs, axis=1)
    out = conv1d_ref(out, p['conv3_w'], p['conv3_b'])
    out = jnp.maximum(out, 0.0)
    out = bn_ref(out, p['bn3'])
    s = jnp.mean(out, axis=2, keepdims=True)
    s = conv1d_ref(s, p['se_w1'], p['se_b1'])
    s = jnp.maximum(s, 0.0)
    s = jax.nn.sigmoid(conv1d_ref(s, p['se_w2'], p['se_b2']))
    return out * s + residual


if __name__ == "__main__":
    key = jax.random.PRNGKey(0)
    kx, kpar = jax.random.split(key)
    x = jax.random.normal(kx, (B, INPLANES, T), jnp.float32)   # (batch, inplanes, seq_len), NCT

    p = init_params(kpar)
    slab = make_kernel_params(p)

    out = jax.block_until_ready(bottle2neck_pallas(x, slab))
    assert out.shape == (B, PLANES, T)

    ref = ref_forward(x, p)
    err = float(jnp.max(jnp.abs(out - ref)))
    if not err < 1e-3:
        raise AssertionError(f"kernel/ref mismatch, max abs err = {err}")
    print("KERNEL_OK")
</pallas_src>

<mosaic_0001>
module attributes {stable_mosaic.version = 11 : i64} {
  func.func @bottle2neck_kernel(%arg0: memref<2x32x16xf32, #tpu.memory_space<vmem>>, %arg1: memref<416x128xf32, #tpu.memory_space<vmem>>, %arg2: memref<2x32x16xf32, #tpu.memory_space<vmem>>) attributes {dimension_semantics = [], scalar_prefetch = 0 : i64, scratch_operands = 0 : i64, tpu.core_type = #tpu.core_type<tc>} {
    %c0 = arith.constant 0 : index
    %c0_0 = arith.constant 0 : index
    %c0_1 = arith.constant 0 : index
    %0 = vector.load %arg0[%c0, %c0_0, %c0_1] : memref<2x32x16xf32, #tpu.memory_space<vmem>>, vector<1x32x16xf32>
    %1 = vector.shape_cast %0 : vector<1x32x16xf32> to vector<32x16xf32>
    %c1 = arith.constant 1 : index
    %c0_2 = arith.constant 0 : index
    %c0_3 = arith.constant 0 : index
    %2 = vector.load %arg0[%c1, %c0_2, %c0_3] : memref<2x32x16xf32, #tpu.memory_space<vmem>>, vector<1x32x16xf32>
    %3 = vector.shape_cast %2 : vector<1x32x16xf32> to vector<32x16xf32>
    %4 = tpu.concatenate %1, %3 in 1 : vector<32x16xf32>, vector<32x16xf32> -> vector<32x32xf32>
    %c0_4 = arith.constant 0 : index
    %c0_5 = arith.constant 0 : index
    %5 = vector.load %arg1[%c0_4, %c0_5] : memref<416x128xf32, #tpu.memory_space<vmem>>, vector<32x32xf32>
    %cst = arith.constant dense<0.000000e+00> : vector<32x32xf32>
    %6 = tpu.matmul %5, %4, %cst {dimension_numbers = #tpu.dot_dimension_numbers<[1], [0], [0], [1], [0, 0, 1, 1], [], []>} : vector<32x32xf32>, vector<32x32xf32>, vector<32x32xf32> -> vector<32x32xf32>
    %c256 = arith.constant 256 : index
    %c0_6 = arith.constant 0 : index
    %7 = vector.load %arg1[%c256, %c0_6] : memref<416x128xf32, #tpu.memory_space<vmem>>, vector<32x1xf32>
    %8 = vector.broadcast %7 : vector<32x1xf32> to vector<32x32xf32>
    %9 = arith.addf %6, %8 : vector<32x32xf32>
    %cst_7 = arith.constant 0.000000e+00 : f32
    %10 = vector.broadcast %cst_7 : f32 to vector<32x32xf32>
    %11 = arith.maximumf %9, %10 : vector<32x32xf32>
    %c256_8 = arith.constant 256 : index
    %c1_9 = arith.constant 1 : index
    %12 = vector.load %arg1[%c256_8, %c1_9] : memref<416x128xf32, #tpu.memory_space<vmem>>, vector<32x1xf32>
    %13 = vector.broadcast %12 : vector<32x1xf32> to vector<32x32xf32>
    %14 = arith.mulf %11, %13 : vector<32x32xf32>
    %c256_10 = arith.constant 256 : index
    %c2 = arith.constant 2 : index
    %15 = vector.load %arg1[%c256_10, %c2] : memref<416x128xf32, #tpu.memory_space<vmem>>, vector<32x1xf32>
    %16 = vector.broadcast %15 : vector<32x1xf32> to vector<32x32xf32>
    %17 = arith.addf %14, %16 : vector<32x32xf32>
    %18 = tpu.iota {dimensions = array<i32: 1>} : vector<4x32xi32>
    %c16_i32 = arith.constant 16 : i32
    %c0_i32 = arith.constant 0 : i32
    %19 = arith.cmpi eq, %c16_i32, %c0_i32 : i32
    %c1_i32 = arith.constant 1 : i32
    %20 = arith.select %19, %c1_i32, %c16_i32 : i32
    %21 = vector.broadcast %20 : i32 to vector<4x32xi32>
    %22 = arith.remsi %18, %21 : vector<4x32xi32>
    %c0_i32_11 = arith.constant 0 : i32
    %23 = vector.broadcast %c0_i32_11 : i32 to vector<4x32xi32>
    %24 = arith.cmpi ne, %22, %23 : vector<4x32xi32>
    %c0_i32_12 = arith.constant 0 : i32
    %25 = vector.broadcast %c0_i32_12 : i32 to vector<4x32xi32>
    %26 = arith.cmpi slt, %22, %25 : vector<4x32xi32>
    %c0_i32_13 = arith.constant 0 : i32
    %27 = arith.cmpi slt, %20, %c0_i32_13 : i32
    %28 = vector.broadcast %27 : i1 to vector<4x32xi1>
    %29 = vector.broadcast %28 : vector<4x32xi1> to vector<4x32xi1>
    %30 = arith.xori %26, %29 : vector<4x32xi1>
    %31 = arith.andi %30, %24 : vector<4x32xi1>
    %32 = vector.broadcast %20 : i32 to vector<4x32xi32>
    %33 = arith.addi %22, %32 : vector<4x32xi32>
    %34 = arith.select %31, %33, %22 : vector<4x32xi1>, vector<4x32xi32>
    %c2_i32 = arith.constant 2 : i32
    %35 = vector.broadcast %c2_i32 : i32 to vector<4x32xi32>
    %36 = arith.cmpi sge, %34, %35 : vector<4x32xi32>
    %37 = arith.extui %36 : vector<4x32xi1> to vector<4x32xi32>
    %38 = arith.sitofp %37 : vector<4x32xi32> to vector<4x32xf32>
    %c14_i32 = arith.constant 14 : i32
    %39 = vector.broadcast %c14_i32 : i32 to vector<4x32xi32>
    %40 = arith.cmpi slt, %34, %39 : vector<4x32xi32>
    %41 = arith.extui %40 : vector<4x32xi1> to vector<4x32xi32>
    %42 = arith.sitofp %41 : vector<4x32xi32> to vector<4x32xf32>
    %43 = vector.extract_strided_slice %17 {offsets = [0, 0], sizes = [4, 32], strides = [1, 1]} : vector<32x32xf32> to vector<4x32xf32>
    %c2_i32_14 = arith.constant 2 : i32
    %44 = tpu.dynamic_rotate %43 by %c2_i32_14 dim 1 : vector<4x32xf32>, i32 -> vector<4x32xf32>
    %45 = arith.mulf %44, %38 : vector<4x32xf32>
    %c30_i32 = arith.constant 30 : i32
    %46 = tpu.dynamic_rotate %43 by %c30_i32 dim 1 : vector<4x32xf32>, i32 -> vector<4x32xf32>
    %47 = arith.mulf %46, %42 : vector<4x32xf32>
    %48 = tpu.concatenate %45, %43, %47 in 0 : vector<4x32xf32>, vector<4x32xf32>, vector<4x32xf32> -> vector<12x32xf32>
    %c224 = arith.constant 224 : index
    %c0_15 = arith.constant 0 : index
    %49 = vector.load %arg1[%c224, %c0_15] : memref<416x128xf32, #tpu.memory_space<vmem>>, vector<4x12xf32>
    %cst_16 = arith.constant dense<0.000000e+00> : vector<4x32xf32>
    %50 = tpu.matmul %49, %48, %cst_16 {dimension_numbers = #tpu.dot_dimension_numbers<[1], [0], [0], [1], [0, 0, 1, 1], [], []>} : vector<4x12xf32>, vector<12x32xf32>, vector<4x32xf32> -> vector<4x32xf32>
    %c256_17 = arith.constant 256 : index
    %c8 = arith.constant 8 : index
    %51 = vector.load %arg1[%c256_17, %c8] : memref<416x128xf32, #tpu.memory_space<vmem>>, vector<4x1xf32>
    %52 = vector.broadcast %51 : vector<4x1xf32> to vector<4x32xf32>
    %53 = arith.addf %50, %52 : vector<4x32xf32>
    %cst_18 = arith.constant 0.000000e+00 : f32
    %54 = vector.broadcast %cst_18 : f32 to vector<4x32xf32>
    %55 = arith.maximumf %53, %54 : vector<4x32xf32>
    %c256_19 = arith.constant 256 : index
    %c9 = arith.constant 9 : index
    %56 = vector.load %arg1[%c256_19, %c9] : memref<416x128xf32, #tpu.memory_space<vmem>>, vector<4x1xf32>
    %57 = vector.broadcast %56 : vector<4x1xf32> to vector<4x32xf32>
    %58 = arith.mulf %55, %57 : vector<4x32xf32>
    %c256_20 = arith.constant 256 : index
    %c10 = arith.constant 10 : index
    %59 = vector.load %arg1[%c256_20, %c10] : memref<416x128xf32, #tpu.memory_space<vmem>>, vector<4x1xf32>
    %60 = vector.broadcast %59 : vector<4x1xf32> to vector<4x32xf32>
    %61 = arith.addf %58, %60 : vector<4x32xf32>
    %62 = vector.extract_strided_slice %17 {offsets = [4, 0], sizes = [4, 32], strides = [1, 1]} : vector<32x32xf32> to vector<4x32xf32>
    %63 = arith.addf %61, %62 : vector<4x32xf32>
    %c2_i32_21 = arith.constant 2 : i32
    %64 = tpu.dynamic_rotate %63 by %c2_i32_21 dim 1 : vector<4x32xf32>, i32 -> vector<4x32xf32>
    %65 = arith.mulf %64, %38 : vector<4x32xf32>
    %c30_i32_22 = arith.constant 30 : i32
    %66 = tpu.dynamic_rotate %63 by %c30_i32_22 dim 1 : vector<4x32xf32>, i32 -> vector<4x32xf32>
    %67 = arith.mulf %66, %42 : vector<4x32xf32>
    %68 = tpu.concatenate %65, %63, %67 in 0 : vector<4x32xf32>, vector<4x32xf32>, vector<4x32xf32> -> vector<12x32xf32>
    %c228 = arith.constant 228 : index
    %c0_23 = arith.constant 0 : index
    %69 = vector.load %arg1[%c228, %c0_23] : memref<416x128xf32, #tpu.memory_space<vmem>>, vector<4x12xf32>
    %cst_24 = arith.constant dense<0.000000e+00> : vector<4x32xf32>
    %70 = tpu.matmul %69, %68, %cst_24 {dimension_numbers = #tpu.dot_dimension_numbers<[1], [0], [0], [1], [0, 0, 1, 1], [], []>} : vector<4x12xf32>, vector<12x32xf32>, vector<4x32xf32> -> vector<4x32xf32>
    %c260 = arith.constant 260 : index
    %c8_25 = arith.constant 8 : index
    %71 = vector.load %arg1[%c260, %c8_25] : memref<416x128xf32, #tpu.memory_space<vmem>>, vector<4x1xf32>
    %72 = vector.broadcast %71 : vector<4x1xf32> to vector<4x32xf32>
    %73 = arith.addf %70, %72 : vector<4x32xf32>
    %cst_26 = arith.constant 0.000000e+00 : f32
    %74 = vector.broadcast %cst_26 : f32 to vector<4x32xf32>
    %75 = arith.maximumf %73, %74 : vector<4x32xf32>
    %c260_27 = arith.constant 260 : index
    %c9_28 = arith.constant 9 : index
    %76 = vector.load %arg1[%c260_27, %c9_28] : memref<416x128xf32, #tpu.memory_space<vmem>>, vector<4x1xf32>
    %77 = vector.broadcast %76 : vector<4x1xf32> to vector<4x32xf32>
    %78 = arith.mulf %75, %77 : vector<4x32xf32>
    %c260_29 = arith.constant 260 : index
    %c10_30 = arith.constant 10 : index
    %79 = vector.load %arg1[%c260_29, %c10_30] : memref<416x128xf32, #tpu.memory_space<vmem>>, vector<4x1xf32>
    %80 = vector.broadcast %79 : vector<4x1xf32> to vector<4x32xf32>
    %81 = arith.addf %78, %80 : vector<4x32xf32>
    %82 = vector.extract_strided_slice %17 {offsets = [8, 0], sizes = [4, 32], strides = [1, 1]} : vector<32x32xf32> to vector<4x32xf32>
    %83 = arith.addf %81, %82 : vector<4x32xf32>
    %c2_i32_31 = arith.constant 2 : i32
    %84 = tpu.dynamic_rotate %83 by %c2_i32_31 dim 1 : vector<4x32xf32>, i32 -> vector<4x32xf32>
    %85 = arith.mulf %84, %38 : vector<4x32xf32>
    %c30_i32_32 = arith.constant 30 : i32
    %86 = tpu.dynamic_rotate %83 by %c30_i32_32 dim 1 : vector<4x32xf32>, i32 -> vector<4x32xf32>
    %87 = arith.mulf %86, %42 : vector<4x32xf32>
    %88 = tpu.concatenate %85, %83, %87 in 0 : vector<4x32xf32>, vector<4x32xf32>, vector<4x32xf32> -> vector<12x32xf32>
    %c232 = arith.constant 232 : index
    %c0_33 = arith.constant 0 : index
    %89 = vector.load %arg1[%c232, %c0_33] : memref<416x128xf32, #tpu.memory_space<vmem>>, vector<4x12xf32>
    %cst_34 = arith.constant dense<0.000000e+00> : vector<4x32xf32>
    %90 = tpu.matmul %89, %88, %cst_34 {dimension_numbers = #tpu.dot_dimension_numbers<[1], [0], [0], [1], [0, 0, 1, 1], [], []>} : vector<4x12xf32>, vector<12x32xf32>, vector<4x32xf32> -> vector<4x32xf32>
    %c264 = arith.constant 264 : index
    %c8_35 = arith.constant 8 : index
    %91 = vector.load %arg1[%c264, %c8_35] : memref<416x128xf32, #tpu.memory_space<vmem>>, vector<4x1xf32>
    %92 = vector.broadcast %91 : vector<4x1xf32> to vector<4x32xf32>
    %93 = arith.addf %90, %92 : vector<4x32xf32>
    %cst_36 = arith.constant 0.000000e+00 : f32
    %94 = vector.broadcast %cst_36 : f32 to vector<4x32xf32>
    %95 = arith.maximumf %93, %94 : vector<4x32xf32>
    %c264_37 = arith.constant 264 : index
    %c9_38 = arith.constant 9 : index
    %96 = vector.load %arg1[%c264_37, %c9_38] : memref<416x128xf32, #tpu.memory_space<vmem>>, vector<4x1xf32>
    %97 = vector.broadcast %96 : vector<4x1xf32> to vector<4x32xf32>
    %98 = arith.mulf %95, %97 : vector<4x32xf32>
    %c264_39 = arith.constant 264 : index
    %c10_40 = arith.constant 10 : index
    %99 = vector.load %arg1[%c264_39, %c10_40] : memref<416x128xf32, #tpu.memory_space<vmem>>, vector<4x1xf32>
    %100 = vector.broadcast %99 : vector<4x1xf32> to vector<4x32xf32>
    %101 = arith.addf %98, %100 : vector<4x32xf32>
    %102 = vector.extract_strided_slice %17 {offsets = [12, 0], sizes = [4, 32], strides = [1, 1]} : vector<32x32xf32> to vector<4x32xf32>
    %103 = arith.addf %101, %102 : vector<4x32xf32>
    %c2_i32_41 = arith.constant 2 : i32
    %104 = tpu.dynamic_rotate %103 by %c2_i32_41 dim 1 : vector<4x32xf32>, i32 -> vector<4x32xf32>
    %105 = arith.mulf %104, %38 : vector<4x32xf32>
    %c30_i32_42 = arith.constant 30 : i32
    %106 = tpu.dynamic_rotate %103 by %c30_i32_42 dim 1 : vector<4x32xf32>, i32 -> vector<4x32xf32>
    %107 = arith.mulf %106, %42 : vector<4x32xf32>
    %108 = tpu.concatenate %105, %103, %107 in 0 : vector<4x32xf32>, vector<4x32xf32>, vector<4x32xf32> -> vector<12x32xf32>
    %c236 = arith.constant 236 : index
    %c0_43 = arith.constant 0 : index
    %109 = vector.load %arg1[%c236, %c0_43] : memref<416x128xf32, #tpu.memory_space<vmem>>, vector<4x12xf32>
    %cst_44 = arith.constant dense<0.000000e+00> : vector<4x32xf32>
    %110 = tpu.matmul %109, %108, %cst_44 {dimension_numbers = #tpu.dot_dimension_numbers<[1], [0], [0], [1], [0, 0, 1, 1], [], []>} : vector<4x12xf32>, vector<12x32xf32>, vector<4x32xf32> -> vector<4x32xf32>
    %c268 = arith.constant 268 : index
    %c8_45 = arith.constant 8 : index
    %111 = vector.load %arg1[%c268, %c8_45] : memref<416x128xf32, #tpu.memory_space<vmem>>, vector<4x1xf32>
    %112 = vector.broadcast %111 : vector<4x1xf32> to vector<4x32xf32>
    %113 = arith.addf %110, %112 : vector<4x32xf32>
    %cst_46 = arith.constant 0.000000e+00 : f32
    %114 = vector.broadcast %cst_46 : f32 to vector<4x32xf32>
    %115 = arith.maximumf %113, %114 : vector<4x32xf32>
    %c268_47 = arith.constant 268 : index
    %c9_48 = arith.constant 9 : index
    %116 = vector.load %arg1[%c268_47, %c9_48] : memref<416x128xf32, #tpu.memory_space<vmem>>, vector<4x1xf32>
    %117 = vector.broadcast %116 : vector<4x1xf32> to vector<4x32xf32>
    %118 = arith.mulf %115, %117 : vector<4x32xf32>
    %c268_49 = arith.constant 268 : index
    %c10_50 = arith.constant 10 : index
    %119 = vector.load %arg1[%c268_49, %c10_50] : memref<416x128xf32, #tpu.memory_space<vmem>>, vector<4x1xf32>
    %120 = vector.broadcast %119 : vector<4x1xf32> to vector<4x32xf32>
    %121 = arith.addf %118, %120 : vector<4x32xf32>
    %122 = vector.extract_strided_slice %17 {offsets = [16, 0], sizes = [4, 32], strides = [1, 1]} : vector<32x32xf32> to vector<4x32xf32>
    %123 = arith.addf %121, %122 : vector<4x32xf32>
    %c2_i32_51 = arith.constant 2 : i32
    %124 = tpu.dynamic_rotate %123 by %c2_i32_51 dim 1 : vector<4x32xf32>, i32 -> vector<4x32xf32>
    %125 = arith.mulf %124, %38 : vector<4x32xf32>
    %c30_i32_52 = arith.constant 30 : i32
    %126 = tpu.dynamic_rotate %123 by %c30_i32_52 dim 1 : vector<4x32xf32>, i32 -> vector<4x32xf32>
    %127 = arith.mulf %126, %42 : vector<4x32xf32>
    %128 = tpu.concatenate %125, %123, %127 in 0 : vector<4x32xf32>, vector<4x32xf32>, vector<4x32xf32> -> vector<12x32xf32>
    %c240 = arith.constant 240 : index
    %c0_53 = arith.constant 0 : index
    %129 = vector.load %arg1[%c240, %c0_53] : memref<416x128xf32, #tpu.memory_space<vmem>>, vector<4x12xf32>
    %cst_54 = arith.constant dense<0.000000e+00> : vector<4x32xf32>
    %130 = tpu.matmul %129, %128, %cst_54 {dimension_numbers = #tpu.dot_dimension_numbers<[1], [0], [0], [1], [0, 0, 1, 1], [], []>} : vector<4x12xf32>, vector<12x32xf32>, vector<4x32xf32> -> vector<4x32xf32>
    %c272 = arith.constant 272 : index
    %c8_55 = arith.constant 8 : index
    %131 = vector.load %arg1[%c272, %c8_55] : memref<416x128xf32, #tpu.memory_space<vmem>>, vector<4x1xf32>
    %132 = vector.broadcast %131 : vector<4x1xf32> to vector<4x32xf32>
    %133 = arith.addf %130, %132 : vector<4x32xf32>
    %cst_56 = arith.constant 0.000000e+00 : f32
    %134 = vector.broadcast %cst_56 : f32 to vector<4x32xf32>
    %135 = arith.maximumf %133, %134 : vector<4x32xf32>
    %c272_57 = arith.constant 272 : index
    %c9_58 = arith.constant 9 : index
    %136 = vector.load %arg1[%c272_57, %c9_58] : memref<416x128xf32, #tpu.memory_space<vmem>>, vector<4x1xf32>
    %137 = vector.broadcast %136 : vector<4x1xf32> to vector<4x32xf32>
    %138 = arith.mulf %135, %137 : vector<4x32xf32>
    %c272_59 = arith.constant 272 : index
    %c10_60 = arith.constant 10 : index
    %139 = vector.load %arg1[%c272_59, %c10_60] : memref<416x128xf32, #tpu.memory_space<vmem>>, vector<4x1xf32>
    %140 = vector.broadcast %139 : vector<4x1xf32> to vector<4x32xf32>
    %141 = arith.addf %138, %140 : vector<4x32xf32>
    %142 = vector.extract_strided_slice %17 {offsets = [20, 0], sizes = [4, 32], strides = [1, 1]} : vector<32x32xf32> to vector<4x32xf32>
    %143 = arith.addf %141, %142 : vector<4x32xf32>
    %c2_i32_61 = arith.constant 2 : i32
    %144 = tpu.dynamic_rotate %143 by %c2_i32_61 dim 1 : vector<4x32xf32>, i32 -> vector<4x32xf32>
    %145 = arith.mulf %144, %38 : vector<4x32xf32>
    %c30_i32_62 = arith.constant 30 : i32
    %146 = tpu.dynamic_rotate %143 by %c30_i32_62 dim 1 : vector<4x32xf32>, i32 -> vector<4x32xf32>
    %147 = arith.mulf %146, %42 : vector<4x32xf32>
    %148 = tpu.concatenate %145, %143, %147 in 0 : vector<4x32xf32>, vector<4x32xf32>, vector<4x32xf32> -> vector<12x32xf32>
    %c244 = arith.constant 244 : index
    %c0_63 = arith.constant 0 : index
    %149 = vector.load %arg1[%c244, %c0_63] : memref<416x128xf32, #tpu.memory_space<vmem>>, vector<4x12xf32>
    %cst_64 = arith.constant dense<0.000000e+00> : vector<4x32xf32>
    %150 = tpu.matmul %149, %148, %cst_64 {dimension_numbers = #tpu.dot_dimension_numbers<[1], [0], [0], [1], [0, 0, 1, 1], [], []>} : vector<4x12xf32>, vector<12x32xf32>, vector<4x32xf32> -> vector<4x32xf32>
    %c276 = arith.constant 276 : index
    %c8_65 = arith.constant 8 : index
    %151 = vector.load %arg1[%c276, %c8_65] : memref<416x128xf32, #tpu.memory_space<vmem>>, vector<4x1xf32>
    %152 = vector.broadcast %151 : vector<4x1xf32> to vector<4x32xf32>
    %153 = arith.addf %150, %152 : vector<4x32xf32>
    %cst_66 = arith.constant 0.000000e+00 : f32
    %154 = vector.broadcast %cst_66 : f32 to vector<4x32xf32>
    %155 = arith.maximumf %153, %154 : vector<4x32xf32>
    %c276_67 = arith.constant 276 : index
    %c9_68 = arith.constant 9 : index
    %156 = vector.load %arg1[%c276_67, %c9_68] : memref<416x128xf32, #tpu.memory_space<vmem>>, vector<4x1xf32>
    %157 = vector.broadcast %156 : vector<4x1xf32> to vector<4x32xf32>
    %158 = arith.mulf %155, %157 : vector<4x32xf32>
    %c276_69 = arith.constant 276 : index
    %c10_70 = arith.constant 10 : index
    %159 = vector.load %arg1[%c276_69, %c10_70] : memref<416x128xf32, #tpu.memory_space<vmem>>, vector<4x1xf32>
    %160 = vector.broadcast %159 : vector<4x1xf32> to vector<4x32xf32>
    %161 = arith.addf %158, %160 : vector<4x32xf32>
    %162 = vector.extract_strided_slice %17 {offsets = [24, 0], sizes = [4, 32], strides = [1, 1]} : vector<32x32xf32> to vector<4x32xf32>
    %163 = arith.addf %161, %162 : vector<4x32xf32>
    %c2_i32_71 = arith.constant 2 : i32
    %164 = tpu.dynamic_rotate %163 by %c2_i32_71 dim 1 : vector<4x32xf32>, i32 -> vector<4x32xf32>
    %165 = arith.mulf %164, %38 : vector<4x32xf32>
    %c30_i32_72 = arith.constant 30 : i32
    %166 = tpu.dynamic_rotate %163 by %c30_i32_72 dim 1 : vector<4x32xf32>, i32 -> vector<4x32xf32>
    %167 = arith.mulf %166, %42 : vector<4x32xf32>
    %168 = tpu.concatenate %165, %163, %167 in 0 : vector<4x32xf32>, vector<4x32xf32>, vector<4x32xf32> -> vector<12x32xf32>
    %c248 = arith.constant 248 : index
    %c0_73 = arith.constant 0 : index
    %169 = vector.load %arg1[%c248, %c0_73] : memref<416x128xf32, #tpu.memory_space<vmem>>, vector<4x12xf32>
    %cst_74 = arith.constant dense<0.000000e+00> : vector<4x32xf32>
    %170 = tpu.matmul %169, %168, %cst_74 {dimension_numbers = #tpu.dot_dimension_numbers<[1], [0], [0], [1], [0, 0, 1, 1], [], []>} : vector<4x12xf32>, vector<12x32xf32>, vector<4x32xf32> -> vector<4x32xf32>
    %c280 = arith.constant 280 : index
    %c8_75 = arith.constant 8 : index
    %171 = vector.load %arg1[%c280, %c8_75] : memref<416x128xf32, #tpu.memory_space<vmem>>, vector<4x1xf32>
    %172 = vector.broadcast %171 : vector<4x1xf32> to vector<4x32xf32>
    %173 = arith.addf %170, %172 : vector<4x32xf32>
    %cst_76 = arith.constant 0.000000e+00 : f32
    %174 = vector.broadcast %cst_76 : f32 to vector<4x32xf32>
    %175 = arith.maximumf %173, %174 : vector<4x32xf32>
    %c280_77 = arith.constant 280 : index
    %c9_78 = arith.constant 9 : index
    %176 = vector.load %arg1[%c280_77, %c9_78] : memref<416x128xf32, #tpu.memory_space<vmem>>, vector<4x1xf32>
    %177 = vector.broadcast %176 : vector<4x1xf32> to vector<4x32xf32>
    %178 = arith.mulf %175, %177 : vector<4x32xf32>
    %c280_79 = arith.constant 280 : index
    %c10_80 = arith.constant 10 : index
    %179 = vector.load %arg1[%c280_79, %c10_80] : memref<416x128xf32, #tpu.memory_space<vmem>>, vector<4x1xf32>
    %180 = vector.broadcast %179 : vector<4x1xf32> to vector<4x32xf32>
    %181 = arith.addf %178, %180 : vector<4x32xf32>
    %182 = vector.extract_strided_slice %17 {offsets = [28, 0], sizes = [4, 32], strides = [1, 1]} : vector<32x32xf32> to vector<4x32xf32>
    %183 = tpu.concatenate %61, %81, %101, %121, %141, %161, %181, %182 in 0 : vector<4x32xf32>, vector<4x32xf32>, vector<4x32xf32>, vector<4x32xf32>, vector<4x32xf32>, vector<4x32xf32>, vector<4x32xf32>, vector<4x32xf32> -> vector<32x32xf32>
    %c32 = arith.constant 32 : index
    %c0_81 = arith.constant 0 : index
    %184 = vector.load %arg1[%c32, %c0_81] : memref<416x128xf32, #tpu.memory_space<vmem>>, vector<32x32xf32>
    %cst_82 = arith.constant dense<0.000000e+00> : vector<32x32xf32>
    %185 = tpu.matmul %184, %183, %cst_82 {dimension_numbers = #tpu.dot_dimension_numbers<[1], [0], [0], [1], [0, 0, 1, 1], [], []>} : vector<32x32xf32>, vector<32x32xf32>, vector<32x32xf32> -> vector<32x32xf32>
    %c256_83 = arith.constant 256 : index
    %c3 = arith.constant 3 : index
    %186 = vector.load %arg1[%c256_83, %c3] : memref<416x128xf32, #tpu.memory_space<vmem>>, vector<32x1xf32>
    %187 = vector.broadcast %186 : vector<32x1xf32> to vector<32x32xf32>
    %188 = arith.addf %185, %187 : vector<32x32xf32>
    %cst_84 = arith.constant 0.000000e+00 : f32
    %189 = vector.broadcast %cst_84 : f32 to vector<32x32xf32>
    %190 = arith.maximumf %188, %189 : vector<32x32xf32>
    %c256_85 = arith.constant 256 : index
    %c4 = arith.constant 4 : index
    %191 = vector.load %arg1[%c256_85, %c4] : memref<416x128xf32, #tpu.memory_space<vmem>>, vector<32x1xf32>
    %192 = vector.broadcast %191 : vector<32x1xf32> to vector<32x32xf32>
    %193 = arith.mulf %190, %192 : vector<32x32xf32>
    %c256_86 = arith.constant 256 : index
    %c5 = arith.constant 5 : index
    %194 = vector.load %arg1[%c256_86, %c5] : memref<416x128xf32, #tpu.memory_space<vmem>>, vector<32x1xf32>
    %195 = vector.broadcast %194 : vector<32x1xf32> to vector<32x32xf32>
    %196 = arith.addf %193, %195 : vector<32x32xf32>
    %197 = vector.extract_strided_slice %196 {offsets = [0, 0], sizes = [32, 16], strides = [1, 1]} : vector<32x32xf32> to vector<32x16xf32>
    %cst_87 = arith.constant dense<0.000000e+00> : vector<32xf32>
    %198 = vector.multi_reduction <add>, %197, %cst_87 [1] : vector<32x16xf32> to vector<32xf32>
    %199 = vector.shape_cast %198 : vector<32xf32> to vector<32x1xf32>
    %cst_88 = arith.constant 1.600000e+01 : f32
    %200 = vector.broadcast %cst_88 : f32 to vector<32x1xf32>
    %201 = arith.divf %199, %200 : vector<32x1xf32>
    %202 = vector.extract_strided_slice %196 {offsets = [0, 16], sizes = [32, 16], strides = [1, 1]} : vector<32x32xf32> to vector<32x16xf32>
    %cst_89 = arith.constant dense<0.000000e+00> : vector<32xf32>
    %203 = vector.multi_reduction <add>, %202, %cst_89 [1] : vector<32x16xf32> to vector<32xf32>
    %204 = vector.shape_cast %203 : vector<32xf32> to vector<32x1xf32>
    %cst_90 = arith.constant 1.600000e+01 : f32
    %205 = vector.broadcast %cst_90 : f32 to vector<32x1xf32>
    %206 = arith.divf %204, %205 : vector<32x1xf32>
    %207 = tpu.concatenate %201, %206 in 1 : vector<32x1xf32>, vector<32x1xf32> -> vector<32x2xf32>
    %c64 = arith.constant 64 : index
    %c0_91 = arith.constant 0 : index
    %208 = vector.load %arg1[%c64, %c0_91] : memref<416x128xf32, #tpu.memory_space<vmem>>, vector<128x32xf32>
    %cst_92 = arith.constant dense<0.000000e+00> : vector<128x2xf32>
    %209 = tpu.matmul %208, %207, %cst_92 {dimension_numbers = #tpu.dot_dimension_numbers<[1], [0], [0], [1], [0, 0, 1, 1], [], []>} : vector<128x32xf32>, vector<32x2xf32>, vector<128x2xf32> -> vector<128x2xf32>
    %c288 = arith.constant 288 : index
    %c0_93 = arith.constant 0 : index
    %210 = vector.load %arg1[%c288, %c0_93] : memref<416x128xf32, #tpu.memory_space<vmem>>, vector<128x1xf32>
    %211 = vector.broadcast %210 : vector<128x1xf32> to vector<128x2xf32>
    %212 = arith.addf %209, %211 : vector<128x2xf32>
    %cst_94 = arith.constant 0.000000e+00 : f32
    %213 = vector.broadcast %cst_94 : f32 to vector<128x2xf32>
    %214 = arith.maximumf %212, %213 : vector<128x2xf32>
    %c192 = arith.constant 192 : index
    %c0_95 = arith.constant 0 : index
    %215 = vector.load %arg1[%c192, %c0_95] : memref<416x128xf32, #tpu.memory_space<vmem>>, vector<32x128xf32>
    %cst_96 = arith.constant dense<0.000000e+00> : vector<32x2xf32>
    %216 = tpu.matmul %215, %214, %cst_96 {dimension_numbers = #tpu.dot_dimension_numbers<[1], [0], [0], [1], [0, 0, 1, 1], [], []>} : vector<32x128xf32>, vector<128x2xf32>, vector<32x2xf32> -> vector<32x2xf32>
    %c256_97 = arith.constant 256 : index
    %c6 = arith.constant 6 : index
    %217 = vector.load %arg1[%c256_97, %c6] : memref<416x128xf32, #tpu.memory_space<vmem>>, vector<32x1xf32>
    %218 = vector.broadcast %217 : vector<32x1xf32> to vector<32x2xf32>
    %219 = arith.addf %216, %218 : vector<32x2xf32>
    %220 = arith.negf %219 : vector<32x2xf32>
    %221 = math.exp %220 : vector<32x2xf32>
    %cst_98 = arith.constant 1.000000e+00 : f32
    %222 = vector.broadcast %cst_98 : f32 to vector<32x2xf32>
    %223 = arith.addf %222, %221 : vector<32x2xf32>
    %224 = arith.divf %222, %223 : vector<32x2xf32>
    %225 = vector.extract_strided_slice %196 {offsets = [0, 0], sizes = [32, 16], strides = [1, 1]} : vector<32x32xf32> to vector<32x16xf32>
    %226 = vector.extract_strided_slice %224 {offsets = [0, 0], sizes = [32, 1], strides = [1, 1]} : vector<32x2xf32> to vector<32x1xf32>
    %227 = vector.broadcast %226 : vector<32x1xf32> to vector<32x16xf32>
    %228 = arith.mulf %225, %227 : vector<32x16xf32>
    %229 = vector.extract_strided_slice %4 {offsets = [0, 0], sizes = [32, 16], strides = [1, 1]} : vector<32x32xf32> to vector<32x16xf32>
    %230 = arith.addf %228, %229 : vector<32x16xf32>
    %c0_99 = arith.constant 0 : index
    %c0_100 = arith.constant 0 : index
    %c0_101 = arith.constant 0 : index
    %231 = vector.load %arg2[%c0_99, %c0_100, %c0_101] : memref<2x32x16xf32, #tpu.memory_space<vmem>>, vector<1x32x16xf32>
    %232 = vector.shape_cast %231 : vector<1x32x16xf32> to vector<32x16xf32>
    %233 = vector.shape_cast %230 : vector<32x16xf32> to vector<1x32x16xf32>
    tpu.vector_store %arg2[%c0_99, %c0_100, %c0_101], %233 {strides = array<i32>} : memref<2x32x16xf32, #tpu.memory_space<vmem>>, vector<1x32x16xf32>,
    %234 = vector.extract_strided_slice %196 {offsets = [0, 16], sizes = [32, 16], strides = [1, 1]} : vector<32x32xf32> to vector<32x16xf32>
    %235 = vector.extract_strided_slice %224 {offsets = [0, 1], sizes = [32, 1], strides = [1, 1]} : vector<32x2xf32> to vector<32x1xf32>
    %236 = vector.broadcast %235 : vector<32x1xf32> to vector<32x16xf32>
    %237 = arith.mulf %234, %236 : vector<32x16xf32>
    %238 = vector.extract_strided_slice %4 {offsets = [0, 16], sizes = [32, 16], strides = [1, 1]} : vector<32x32xf32> to vector<32x16xf32>
    %239 = arith.addf %237, %238 : vector<32x16xf32>
    %c1_102 = arith.constant 1 : index
    %c0_103 = arith.constant 0 : index
    %c0_104 = arith.constant 0 : index
    %240 = vector.load %arg2[%c1_102, %c0_103, %c0_104] : memref<2x32x16xf32, #tpu.memory_space<vmem>>, vector<1x32x16xf32>
    %241 = vector.shape_cast %240 : vector<1x32x16xf32> to vector<32x16xf32>
    %242 = vector.shape_cast %239 : vector<32x16xf32> to vector<1x32x16xf32>
    tpu.vector_store %arg2[%c1_102, %c0_103, %c0_104], %242 {strides = array<i32>} : memref<2x32x16xf32, #tpu.memory_space<vmem>>, vector<1x32x16xf32>,
    return
  }
}

</mosaic_0001>

<bundles_post_ra>
// kernel: tpu_custom_call.1
= control target key start
LH: loop header
LB: loop body
LE: loop exit
PB: predicated region body
PF: predicated region fallthrough
CT: control target
= control target key end

     0   :  { %7 = vsyncpa [#allocation3], 0  ;;  %s2352_s9 = smov [#allocation2]   ;;  %s2789_s0 = inlined_call_operand.vmem [shape: f32[2,32,16], index: 0, kind: input, shape index: {}]   ;;  %s2790_s1 = inlined_call_operand.hbm [shape: f32[416,128], index: 1, kind: input, shape index: {}]   ;;  %s2791_s2 = inlined_call_operand.vmem [shape: f32[2,32,16], index: 2, kind: output, shape index: {}]  }
   0x1   :  { %s15_s10 = sshll.u32 %s2352_s9, 4  ;;  %s2328_s13 = scalar_lea.hbm %s2790_s1, 6656  ;;  %s16_s10 = int_to_ptr.vmem [resolvable:$true] %s15_s10 }
   0x2   :  { %p2329_p0 = scmp.ne.s32.totalorder %s2790_s1, %s2328_s13  ;;  %p2332_p1 = scmp.lt.u32.totalorder %s2328_s13, %s2790_s1 }
   0x4   :  { %p2334_p2 = pnand %p2332_p1, %p2329_p0 }
   0x6   :  { %2337 = shalt.err (!%p2334_p2)
}
   0x7   :  { %s2338_s18 = scalar_lea.vmem %s16_s10, 6656  ;;  %p2343_p4 = scmp.lt.s32.totalorder %s16_s10, %s16_s10 }
   0x8   :  { %p2339_p3 = scmp.ne.s32.totalorder %s16_s10, %s2338_s18  ;;  %p2344_p5 = scmp.lt.s32.totalorder %s2338_s18, %s2338_s18 }
   0xa   :  { %p2345_p6 = por %p2344_p5, %p2343_p4 }
   0xc   :  { %p2346_p7 = pnand %p2345_p6, %p2339_p3 }
   0xe   :  { %2349 = shalt.err (!%p2346_p7)
}
   0xf   :  { %s2353_s19 = smov 128   ;;  %s2354_s20 = smov 8  }
  0x10   :  { %21 = dma.hbm_to_vmem [thread:$0]  %s2790_s1, 6656, %s16_s10, [#allocation3], %s2353_s19, %s2353_s19, %s2354_s20  }
  0x11   :  { %2350 = dma.done.wait [#allocation3], 6656  }
  0x12   :  { %2351 = vsyncadd [#allocation3], 4294960640  ;;  %v1843_v0 = vld [vmem:[%s2789_s0 + $0x30] sm:$0xff]  ;;  %v1841_v1 = vld [vmem:[%s2789_s0 + $0x20] sm:$0xff]  ;;  %vm83_vm0 = vcmask 261120   ;;  %s2355_s27 = smov 16   ;;  %v225_v24 = vlaneseq }
  0x13   :  { %42 = vrot.lane.b32.xlu1 %v1843_v0, %s2355_s27  ;;  %38 = vrot.lane.b32.xlu0 %v1841_v1, %s2355_s27  ;;  %v55_v2 = vld [vmem:[#allocation2] sm:$0xff]  ;;  %v1844_v3 = vld [vmem:[%s2789_s0 + $0x38] sm:$0xff]  ;;  %v1842_v4 = vld [vmem:[%s2789_s0 + $0x28] sm:$0xff]  ;;  %v2356_v5 = vmov 0   ;;  %v2357_v6 = vmov 1   ;;  %v2358_v8 = vmov 2  }
  0x14   :  { %1978 = vmatprep.mubr.msk.f32.mxu0 %vm83_vm0, %v55_v2  ;;  %2225 = vset.pattern.permute.xlu0 %v2356_v5  ;;  %v2418_v7 = vld [vmem:[#allocation2 + $0x100] sm:$0xff]  ;;  %v27_v11 = vld [vmem:[%s2789_s0 + $0x10] sm:$0xff]  ;;  %vm50_vm1 = vcmask 130048   ;;  %v28_v13 = vld [vmem:[%s2789_s0 + $0x18] sm:$0xff]  ;;  %v226_v30 = vand.u32 127, %v225_v24  ;;  %v2360_v36 = vmov 0.0  }
  0x15   :  { %2226 = vset.pattern.permute.xlu1 %v2357_v6  ;;  %v25_v12 = vld [vmem:[%s2789_s0] sm:$0xff]  ;;  %v26_v14 = vld [vmem:[%s2789_s0 + $0x8] sm:$0xff]  ;;  %s2359_s0 = smov 32   ;;  %s2361_s11 = smov 2   ;;  %vm245_vm3 = vcmask 1047808   ;;  %v2364_v48 = vmov 0.0|0.0  }
  0x16   :  { %v56_v23 = vld [vmem:[#allocation2 + $0x8] sm:$0xff]  ;;  %v231_v34 = vand.u32 15, %v226_v30  ;;  %s2362_s12 = smov 30   ;;  %s2363_s13 = smov 28   ;;  %2125 = vmatprep.subr.bf16.mxu1 %v2364_v48  ;;  %vm2365_vm5 = vmmov 0   ;;  %vm270_vm6 = vcmask 1043456  }
  0x17   :  { %44 = vrot.lane.b32.xlu1 %v1844_v3, %s2355_s27  ;;  %40 = vrot.lane.b32.xlu0 %v1842_v4, %s2355_s27  ;;  %v273_v51 = vld [vmem:[#allocation2 + $0x100] sm:$0xf]  ;;  %v2366_v53 = vmov 8   ;;  %v2367_v54 = vmov 9   ;;  %s2368_s14 = smov 98   ;;  %v2369_v58 = vmov 10  }
  0x18   :  { %vm242_vm2 = vcmp.lt.s32.totalorder %v231_v34, 14  ;;  %vm239_vm4 = vcmp.ge.s32.totalorder %v231_v34, 2  ;;  %1988 = vmatprep.mubr.msk.f32.mxu1 %vm2365_vm5, %v2360_v36  ;;  %vm2370_vm7 = vmmov 1   ;;  %v272_v0 = vld [vmem:[#allocation2 + $0xe0] sm:$0xf]  ;;  %vm285_vm9 = vcmask 97280  }
  0x19   :  { %v1850_v37 = vsel %vm242_vm2, 1.0, %v2360_v36  ;;  %v1849_v41 = vsel %vm239_vm4, 1.0, %v2360_v36  ;;  %vm2486_vm8 = vmpackc.low %vm270_vm6, %vm2370_vm7  ;;  %v2373_v62 = vmov 5   ;;  %s2374_s15 = smov 112   ;;  %vm1304_vm10 = vcmask 7168  }
  0x1b   :  { %65 = vperm.xlu0 %2225, %v2418_v7   ;;  %186 = vperm.xlu1 %2226, %v2418_v7  }
  0x1f   :  { %2227 = vset.pattern.permute.xlu1 %v2358_v8  ;;  %2238 = vset.pattern.permute.xlu0 %v2366_v53 }
  0x20   :  { %206 = vperm.xlu1 %2227, %v2418_v7  }
  0x24   :  { %2239 = vset.pattern.permute.xlu1 %v2367_v54 }
  0x85   :  { %v43_v9 = vpop.permute.xlu1 %42  ;;  %v39_v10 = vpop.permute.xlu0 %38 }
  0x86   :  { %v2437_v17 = vsel %vm50_vm1, %v27_v11, %v43_v9  ;;  %v2440_v18 = vsel %vm50_vm1, %v25_v12, %v39_v10 }
  0x89   :  { %v45_v15 = vpop.permute.xlu1 %44  ;;  %v41_v16 = vpop.permute.xlu0 %40 }
  0x8a   :  { %v2443_v19 = vsel %vm50_vm1, %v28_v13, %v45_v15  ;;  %v2446_v20 = vsel %vm50_vm1, %v26_v14, %v41_v16 }
  0x8b   :  { %v2117_v21 = vpack.c.bf16 %v2446_v20, %v2440_v18  ;;  %v2121_v22 = vpack.c.bf16 %v2443_v19, %v2437_v17 }
  0x8d   :  { %2118 = vmatprep.subr.bf16.mxu0 %v2117_v21 }
  0x8e   :  { %2120 = vmatpush3.bf16.msra.mxu0 %v2117_v21 }
  0x8f   :  { %2122 = vmatprep.subr.bf16.mxu0 %v2121_v22 }
  0x92   :  { %2124 = vmatpush3.bf16.msra.mxu0 %v2121_v22 }
  0x93   :  { %2145 = vmatprep.subr.bf16.mxu0 %v2364_v48 }
  0x95   :  { %1979 = vmatmul.mubr.msk.f32.vlgmr.msra.gmra.mrb[0].mxu0 %vm83_vm0, %v56_v23 }
  0x9a   :  { %v66_v25 = vpop.permute.xlu0 %65  ;;  %v187_v26 = vpop.permute.xlu1 %186 }
  0x9f   :  { %v207_v32 = vpop.permute.xlu1 %206 }
 0x168   :  { %v2453_v27 = vpop.f32.mrb[0].mxu0 }
 0x169   :  { %v162_v28 = vpop.f32.mrb[1].mxu0 }
 0x16a   :  { %v163_v29 = vadd.f32 %v162_v28, %v66_v25  ;;  %v2506_v25 = vld [vmem:[#allocation2 + $0x108] sm:$0xff] }
 0x16c   :  { %v181_v31 = vmax.f32 %v163_v29, 0.0 }
 0x16e   :  { %v201_v33 = vmul.f32 %v187_v26, %v181_v31  ;;  %v392_v26 = vld [vmem:[#allocation2 + $0x104] sm:$0xf] }
 0x170   :  { %v2455_v35 = vadd.f32 %v207_v32, %v201_v33 }
 0x172   :  { %246 = vrot.lane.b32.xlu0 %v2455_v35, %s2359_s0  ;;  %v263_v39 = vrot.slane %v2455_v35, 4 }
 0x174   :  { %v2228_v42 = vpack.i.bf16 %v263_v39, %v1849_v41 }
 0x176   :  { %258 = vrot.lane.b32.xlu0 %v1850_v37, %s2361_s11 }
 0x1e4   :  { %v247_v38 = vpop.permute.xlu0 %246 }
 0x1e5   :  { %v248_v40 = vsel %vm245_vm3, %v247_v38, %v2455_v35  ;;  %v391_v38 = vld [vmem:[#allocation2 + $0xe4] sm:$0xf] }
 0x1e6   :  { %249 = vrot.lane.b32.xlu1 %v248_v40, %s2359_s0 }
 0x1e8   :  { %v2466_v43 = vpop.permute.xlu0 %258 }
 0x1ea   :  { %2229 = vrot.lane.b32.xlu1 %v2228_v42, %s2362_s12 }
 0x258   :  { %v250_v44 = vpop.permute.xlu1 %249 }
 0x259   :  { %v251_v45 = vsel %vm245_vm3, %v250_v44, %v2455_v35 }
 0x25a   :  { %v261_v46 = vmul.f32 %v2466_v43, %v251_v45 }
 0x25c   :  { %268 = vrot.lane.b32.xlu0 %v261_v46, %s2363_s13  ;;  %v2230_v47 = vpop.permute.xlu1 %2229 }
 0x25d   :  { %v2474_v49 = vunpack.i.l.bf16 %v2230_v47  ;;  %v2232_v52 = vunpack.i.h.bf16 %v2230_v47 }
 0x25f   :  { %v256_v50 = vmul.f32 %v2474_v49, %v251_v45 }
 0x260   :  { %276 = vperm.xlu0 %2238, %v273_v51  }
 0x261   :  { %v271_v56 = vsel %vm270_vm6, %v256_v50, %v2232_v52 }
 0x2ce   :  { %v269_v55 = vpop.permute.xlu0 %268 }
 0x2cf   :  { %v2233_v57 = vpack.i.bf16 %v269_v55, %v271_v56 }
 0x2d1   :  { %2234 = vrot.lane.b32.xlu1 %v2233_v57, %s2368_s14 }
 0x2d5   :  { %363 = vperm.xlu1 %2239, %v273_v51  }
 0x2d9   :  { %2240 = vset.pattern.permute.xlu1 %v2369_v58 }
 0x2da   :  { %368 = vperm.xlu1 %2240, %v273_v51  }
 0x2de   :  { %2246 = vset.pattern.permute.xlu1 %v2356_v5 }
 0x2df   :  { %v277_v1 = vpop.permute.xlu0 %276 }
 0x343   :  { %v2235_v59 = vpop.permute.xlu1 %2234 }
 0x344   :  { %v2237_v60 = vunpack.i.h.bf16 %v2235_v59  ;;  %v2236_v61 = vunpack.i.l.bf16 %v2235_v59 }
 0x346   :  { %v2126_v63 = vpack.c.bf16 %v2237_v60, %v2236_v61 }
 0x348   :  { %2128 = vmatpush3.bf16.msk.msra.mxu1 %vm2486_vm8, %v2126_v63 }
 0x349   :  { %2129 = vmatprep.subr.bf16.mxu1 %v2364_v48 }
 0x34b   :  { %1989 = vmatmul.mubr.msk.f32.vlgmr.msra.gmra.mrb[0].mxu1 %vm285_vm9, %v272_v0 }
 0x34c   :  { %1995 = vmatprep.mubr.msk.f32.mxu1 %vm2365_vm5, %v2360_v36 }
 0x354   :  { %v364_v2 = vpop.permute.xlu1 %363 }
 0x359   :  { %v369_v11 = vpop.permute.xlu1 %368 }
 0x41e   :  { %v357_v3 = vpop.f32.mrb[0].mxu1 }
 0x41f   :  { %v358_v4 = vadd.f32 %v357_v3, %v277_v1  ;;  %v1990_v9 = vpop.f32.mrb[1].mxu1 }
 0x421   :  { %v361_v10 = vmax.f32 %v358_v4, 0.0  ;;  %v509_v4 = vld [vmem:[#allocation2 + $0x108] sm:$0xf] }
 0x423   :  { %v366_v12 = vmul.f32 %v364_v2, %v361_v10 }
 0x425   :  { %v2496_v13 = vadd.f32 %v369_v11, %v366_v12 }
 0x427   :  { %v373_v14 = vadd.f32 %v2496_v13, %v263_v39 }
 0x429   :  { %374 = vrot.lane.b32.xlu0 %v373_v14, %s2359_s0  ;;  %v383_v15 = vrot.slane %v373_v14, 4 }
 0x42d   :  { %384 = vrot.lane.b32.xlu0 %v383_v15, %s2362_s12 }
 0x49b   :  { %v375_v16 = vpop.permute.xlu0 %374 }
 0x49c   :  { %v376_v21 = vsel %vm245_vm3, %v375_v16, %v373_v14 }
 0x49d   :  { %377 = vrot.lane.b32.xlu1 %v376_v21, %s2359_s0 }
 0x49f   :  { %v385_v29 = vpop.permute.xlu0 %384 }
 0x50f   :  { %v378_v22 = vpop.permute.xlu1 %377 }
 0x510   :  { %v379_v23 = vsel %vm245_vm3, %v378_v22, %v373_v14 }
 0x511   :  { %v381_v24 = vmul.f32 %v379_v23, %v2466_v43  ;;  %v380_v28 = vmul.f32 %v2474_v49, %v379_v23  ;;  %v508_v23 = vld [vmem:[#allocation2 + $0xe8] sm:$0xf] }
 0x513   :  { %388 = vrot.lane.b32.xlu1 %v381_v24, %s2363_s13  ;;  %v390_v31 = vsel %vm270_vm6, %v380_v28, %v385_v29 }
 0x517   :  { %70 = vperm.xlu1 %2246, %v2506_v25  }
 0x51b   :  { %2247 = vset.pattern.permute.xlu1 %v2357_v6 }
 0x51c   :  { %190 = vperm.xlu1 %2247, %v2506_v25  }
 0x520   :  { %2249 = vset.pattern.permute.xlu1 %v2358_v8 }
 0x521   :  { %210 = vperm.xlu1 %2249, %v2506_v25  }
 0x525   :  { %2250 = vset.pattern.permute.xlu1 %v2369_v58 }
 0x526   :  { %486 = vperm.xlu1 %2250, %v392_v26  }
 0x52a   :  { %2256 = vset.pattern.permute.xlu1 %v2366_v53 }
 0x585   :  { %v389_v30 = vpop.permute.xlu1 %388 }
 0x586   :  { %v2241_v32 = vpack.i.bf16 %v389_v30, %v390_v31 }
 0x588   :  { %2242 = vrot.lane.b32.xlu0 %v2241_v32, %s2368_s14 }
 0x58c   :  { %395 = vperm.xlu0 %2238, %v392_v26  }
 0x590   :  { %2248 = vset.pattern.permute.xlu0 %v2367_v54 }
 0x591   :  { %481 = vperm.xlu0 %2248, %v392_v26  }
 0x596   :  { %v71_v39 = vpop.permute.xlu1 %70 }
 0x597   :  { %v168_v41 = vadd.f32 %v2453_v27, %v71_v39 }
 0x599   :  { %v182_v46 = vmax.f32 %v168_v41, 0.0  ;;  %v57_v41 = vld [vmem:[#allocation2 + $0x10] sm:$0xff] }
 0x59a   :  { %1981 = vmatprep.mubr.msk.f32.mxu0 %vm83_vm0, %v57_v41 }
 0x59b   :  { %v191_v40 = vpop.permute.xlu1 %190 }
 0x59c   :  { %v202_v56 = vmul.f32 %v191_v40, %v182_v46 }
 0x5a0   :  { %v211_v44 = vpop.permute.xlu1 %210 }
 0x5a1   :  { %v222_v59 = vadd.f32 %v211_v44, %v202_v56 }
 0x5a5   :  { %v487_v55 = vpop.permute.xlu1 %486 }
 0x5fa   :  { %v2243_v33 = vpop.permute.xlu0 %2242 }
 0x5fb   :  { %v2245_v34 = vunpack.i.h.bf16 %v2243_v33  ;;  %v2244_v35 = vunpack.i.l.bf16 %v2243_v33 }
 0x5fd   :  { %v2130_v37 = vpack.c.bf16 %v2245_v34, %v2244_v35  ;;  %v608_v34 = vrot.slane %v222_v59, 4 }
 0x5ff   :  { %2132 = vmatpush3.bf16.msk.msra.mxu1 %vm2486_vm8, %v2130_v37 }
 0x600   :  { %2133 = vmatprep.subr.bf16.mxu1 %v2364_v48 }
 0x602   :  { %1996 = vmatmul.mubr.msk.f32.vlgmr.msra.gmra.mrb[2].mxu1 %vm285_vm9, %v391_v38 }
 0x603   :  { %2002 = vmatprep.mubr.msk.f32.mxu1 %vm2365_vm5, %v2360_v36 }
 0x60b   :  { %v396_v42 = vpop.permute.xlu0 %395 }
 0x610   :  { %v482_v51 = vpop.permute.xlu0 %481 }
 0x6d5   :  { %v475_v45 = vpop.f32.mrb[2].mxu1 }
 0x6d6   :  { %v476_v47 = vadd.f32 %v475_v45, %v396_v42  ;;  %v1997_v50 = vpop.f32.mrb[3].mxu1  ;;  %v58_v42 = vld [vmem:[#allocation2 + $0x18] sm:$0xff] }
 0x6d7   :  { %1982 = vmatmul.mubr.msk.f32.gmra.mrb[2].mxu0 %vm83_vm0, %v58_v42  ;;  %v2563_v50 = vld [vmem:[#allocation2 + $0x110] sm:$0xff] }
 0x6d8   :  { %v479_v52 = vmax.f32 %v476_v47, 0.0  ;;  %2023 = vmatprep.mubr.msk.f32.mxu0 %vm2365_vm5, %v2360_v36 }
 0x6da   :  { %v484_v57 = vmul.f32 %v482_v51, %v479_v52 }
 0x6dc   :  { %v2526_v60 = vadd.f32 %v487_v55, %v484_v57  ;;  %v629_v57 = vld [vmem:[#allocation2 + $0x10c] sm:$0xf] }
 0x6de   :  { %v490_v61 = vadd.f32 %v2526_v60, %v222_v59 }
 0x6e0   :  { %491 = vrot.lane.b32.xlu0 %v490_v61, %s2359_s0  ;;  %v500_v63 = vrot.slane %v490_v61, 4 }
 0x6e4   :  { %501 = vrot.lane.b32.xlu0 %v500_v63, %s2362_s12 }
 0x752   :  { %v492_v27 = vpop.permute.xlu0 %491 }
 0x753   :  { %v493_v0 = vsel %vm245_vm3, %v492_v27, %v490_v61 }
 0x754   :  { %494 = vrot.lane.b32.xlu1 %v493_v0, %s2359_s0 }
 0x756   :  { %v502_v10 = vpop.permute.xlu0 %501 }
 0x7aa   :  { %v2576_v59 = vpop.f32.mrb[2].mxu0 }
 0x7c6   :  { %v495_v1 = vpop.permute.xlu1 %494 }
 0x7c7   :  { %v496_v2 = vsel %vm245_vm3, %v495_v1, %v490_v61  ;;  %v172_v61 = vpop.f32.mrb[3].mxu0 }
 0x7c8   :  { %v498_v3 = vmul.f32 %v496_v2, %v2466_v43  ;;  %v497_v9 = vmul.f32 %v2474_v49, %v496_v2  ;;  %v628_v2 = vld [vmem:[#allocation2 + $0xec] sm:$0xf] }
 0x7ca   :  { %505 = vrot.lane.b32.xlu1 %v498_v3, %s2363_s13  ;;  %v507_v12 = vsel %vm270_vm6, %v497_v9, %v502_v10 }
 0x7ce   :  { %512 = vperm.xlu1 %2256, %v509_v4  }
 0x7d2   :  { %2257 = vset.pattern.permute.xlu1 %v2369_v58 }
 0x7d3   :  { %603 = vperm.xlu1 %2257, %v509_v4  }
 0x7d7   :  { %2263 = vset.pattern.permute.xlu1 %v2356_v5 }
 0x83c   :  { %v506_v11 = vpop.permute.xlu1 %505 }
 0x83d   :  { %v2251_v14 = vpack.i.bf16 %v506_v11, %v507_v12 }
 0x83f   :  { %2252 = vrot.lane.b32.xlu0 %v2251_v14, %s2368_s14 }
 0x843   :  { %598 = vperm.xlu0 %2248, %v509_v4  }
 0x847   :  { %2264 = vset.pattern.permute.xlu0 %v2366_v53 }
 0x84d   :  { %v513_v24 = vpop.permute.xlu1 %512 }
 0x852   :  { %v604_v32 = vpop.permute.xlu1 %603 }
 0x8b1   :  { %v2253_v15 = vpop.permute.xlu0 %2252 }
 0x8b2   :  { %v2255_v16 = vunpack.i.h.bf16 %v2253_v15  ;;  %v2254_v21 = vunpack.i.l.bf16 %v2253_v15 }
 0x8b4   :  { %v2134_v22 = vpack.c.bf16 %v2255_v16, %v2254_v21 }
 0x8b6   :  { %2136 = vmatpush3.bf16.msk.msra.mxu1 %vm2486_vm8, %v2134_v22 }
 0x8b7   :  { %2137 = vmatprep.subr.bf16.mxu1 %v2364_v48 }
 0x8b9   :  { %2003 = vmatmul.mubr.msk.f32.vlgmr.msra.gmra.mrb[4].mxu1 %vm285_vm9, %v508_v23 }
 0x8ba   :  { %2009 = vmatprep.mubr.msk.f32.mxu1 %vm2365_vm5, %v2360_v36 }
 0x8c2   :  { %v599_v31 = vpop.permute.xlu0 %598 }
 0x98c   :  { %v592_v26 = vpop.f32.mrb[4].mxu1 }
 0x98d   :  { %v593_v28 = vadd.f32 %v592_v26, %v513_v24  ;;  %v2004_v29 = vpop.f32.mrb[5].mxu1 }
 0x98f   :  { %v596_v30 = vmax.f32 %v593_v28, 0.0  ;;  %v1082_v28 = vrot.slane %v2526_v60, 4 }
 0x991   :  { %v601_v33 = vmul.f32 %v599_v31, %v596_v30 }
 0x993   :  { %v2548_v35 = vadd.f32 %v604_v32, %v601_v33  ;;  %v1090_v33 = vsel %vm270_vm6, %v2496_v13, %v1082_v28 }
 0x995   :  { %v610_v37 = vadd.f32 %v608_v34, %v2548_v35 }
 0x997   :  { %611 = vrot.lane.b32.xlu0 %v610_v37, %s2359_s0  ;;  %v620_v38 = vrot.slane %v610_v37, 4 }
 0x99b   :  { %621 = vrot.lane.b32.xlu0 %v620_v38, %s2362_s12 }
 0xa09   :  { %v612_v39 = vpop.permute.xlu0 %611 }
 0xa0a   :  { %v613_v40 = vsel %vm245_vm3, %v612_v39, %v610_v37 }
 0xa0b   :  { %614 = vrot.lane.b32.xlu1 %v613_v40, %s2359_s0 }
 0xa0d   :  { %v622_v51 = vpop.permute.xlu0 %621 }
 0xa7d   :  { %v615_v44 = vpop.permute.xlu1 %614 }
 0xa7e   :  { %v616_v45 = vsel %vm245_vm3, %v615_v44, %v610_v37 }
 0xa7f   :  { %v618_v46 = vmul.f32 %v616_v45, %v2466_v43  ;;  %v617_v47 = vmul.f32 %v2474_v49, %v616_v45 }
 0xa81   :  { %625 = vrot.lane.b32.xlu1 %v618_v46, %s2363_s13  ;;  %v627_v55 = vsel %vm270_vm6, %v617_v47, %v622_v51 }
 0xa85   :  { %75 = vperm.xlu1 %2263, %v2563_v50  }
 0xa89   :  { %2265 = vset.pattern.permute.xlu1 %v2357_v6 }
 0xa8a   :  { %194 = vperm.xlu1 %2265, %v2563_v50  }
 0xa8e   :  { %2266 = vset.pattern.permute.xlu1 %v2367_v54 }
 0xa8f   :  { %718 = vperm.xlu1 %2266, %v629_v57  }
 0xa93   :  { %2268 = vset.pattern.permute.xlu1 %v2369_v58 }
 0xa94   :  { %723 = vperm.xlu1 %2268, %v629_v57  }
 0xa98   :  { %2275 = vset.pattern.permute.xlu1 %v2367_v54 }
 0xaf3   :  { %v626_v52 = vpop.permute.xlu1 %625 }
 0xaf4   :  { %v2258_v56 = vpack.i.bf16 %v626_v52, %v627_v55 }
 0xaf6   :  { %2259 = vrot.lane.b32.xlu0 %v2258_v56, %s2368_s14 }
 0xafa   :  { %632 = vperm.xlu0 %2264, %v629_v57   ;;  %v745_v57 = vld [vmem:[#allocation2 + $0xf0] sm:$0xf] }
 0xafe   :  { %2267 = vset.pattern.permute.xlu0 %v2358_v8 }
 0xaff   :  { %214 = vperm.xlu0 %2267, %v2563_v50  }
 0xb03   :  { %2274 = vset.pattern.permute.xlu0 %v2366_v53 }
 0xb04   :  { %v76_v3 = vpop.permute.xlu1 %75 }
 0xb05   :  { %v173_v9 = vadd.f32 %v172_v61, %v76_v3 }
 0xb07   :  { %v183_v12 = vmax.f32 %v173_v9, 0.0 }
 0xb09   :  { %v195_v4 = vpop.permute.xlu1 %194 }
 0xb0a   :  { %v203_v21 = vmul.f32 %v195_v4, %v183_v12 }
 0xb0e   :  { %v719_v11 = vpop.permute.xlu1 %718 }
 0xb13   :  { %v724_v24 = vpop.permute.xlu1 %723 }
 0xb68   :  { %v2260_v63 = vpop.permute.xlu0 %2259 }
 0xb69   :  { %v2262_v27 = vunpack.i.h.bf16 %v2260_v63  ;;  %v2261_v0 = vunpack.i.l.bf16 %v2260_v63 }
 0xb6b   :  { %v2138_v1 = vpack.c.bf16 %v2262_v27, %v2261_v0 }
 0xb6d   :  { %2140 = vmatpush3.bf16.msk.msra.mxu1 %vm2486_vm8, %v2138_v1 }
 0xb6e   :  { %2141 = vmatprep.subr.bf16.mxu1 %v2364_v48 }
 0xb70   :  { %2010 = vmatmul.mubr.msk.f32.vlgmr.msra.gmra.mrb[6].mxu1 %vm285_vm9, %v628_v2 }
 0xb71   :  { %2016 = vmatprep.mubr.msk.f32.mxu1 %vm2365_vm5, %v2360_v36 }
 0xb79   :  { %v633_v10 = vpop.permute.xlu0 %632 }
 0xb7e   :  { %v215_v23 = vpop.permute.xlu0 %214 }
 0xb7f   :  { %v223_v29 = vadd.f32 %v215_v23, %v203_v21  ;;  %v2619_v21 = vld [vmem:[#allocation2 + $0x118] sm:$0xff] }
 0xb81   :  { %v845_v9 = vrot.slane %v223_v29, 4 }
 0xc43   :  { %v712_v14 = vpop.f32.mrb[6].mxu1 }
 0xc44   :  { %v713_v15 = vadd.f32 %v712_v14, %v633_v10  ;;  %v2011_v16 = vpop.f32.mrb[7].mxu1 }
 0xc46   :  { %v716_v22 = vmax.f32 %v713_v15, 0.0 }
 0xc48   :  { %v721_v26 = vmul.f32 %v719_v11, %v716_v22  ;;  %v866_v22 = vld [vmem:[#allocation2 + $0x114] sm:$0xf] }
 0xc4a   :  { %v726_v30 = vadd.f32 %v724_v24, %v721_v26 }
 0xc4c   :  { %v727_v31 = vadd.f32 %v726_v30, %v223_v29  ;;  %v1085_v32 = vrot.slane %v726_v30, 4 }
 0xc4e   :  { %728 = vrot.lane.b32.xlu1 %v727_v31, %s2359_s0  ;;  %v1091_v34 = vsel %vm270_vm6, %v2548_v35, %v1085_v32  ;;  %v737_v38 = vrot.slane %v727_v31, 4  ;;  %v746_v35 = vld [vmem:[#allocation2 + $0x110] sm:$0xf] }
 0xc4f   :  { %v2590_v37 = vpack.c.bf16 %v1091_v34, %v1090_v33 }
 0xc52   :  { %738 = vrot.lane.b32.xlu1 %v737_v38, %s2362_s12 }
 0xcc0   :  { %v729_v39 = vpop.permute.xlu1 %728 }
 0xcc1   :  { %v730_v60 = vsel %vm245_vm3, %v729_v39, %v727_v31 }
 0xcc2   :  { %731 = vrot.lane.b32.xlu0 %v730_v60, %s2359_s0 }
 0xcc4   :  { %v739_v44 = vpop.permute.xlu1 %738 }
 0xd34   :  { %v732_v40 = vpop.permute.xlu0 %731 }
 0xd35   :  { %v733_v41 = vsel %vm245_vm3, %v732_v40, %v727_v31 }
 0xd36   :  { %v735_v42 = vmul.f32 %v733_v41, %v2466_v43  ;;  %v734_v13 = vmul.f32 %v2474_v49, %v733_v41 }
 0xd38   :  { %742 = vrot.lane.b32.xlu0 %v735_v42, %s2363_s13  ;;  %v744_v46 = vsel %vm270_vm6, %v734_v13, %v739_v44 }
 0xd3c   :  { %749 = vperm.xlu0 %2274, %v746_v35  }
 0xdaa   :  { %v743_v45 = vpop.permute.xlu0 %742 }
 0xdab   :  { %v2269_v47 = vpack.i.bf16 %v743_v45, %v744_v46 }
 0xdad   :  { %2270 = vrot.lane.b32.xlu1 %v2269_v47, %s2368_s14 }
 0xdb1   :  { %835 = vperm.xlu1 %2275, %v746_v35  }
 0xdb5   :  { %2276 = vset.pattern.permute.xlu1 %v2369_v58 }
 0xdb6   :  { %840 = vperm.xlu1 %2276, %v746_v35  }
 0xdba   :  { %2282 = vset.pattern.permute.xlu1 %v2356_v5 }
 0xdbb   :  { %v750_v61 = vpop.permute.xlu0 %749 }
 0xe1f   :  { %v2271_v51 = vpop.permute.xlu1 %2270 }
 0xe20   :  { %v2273_v52 = vunpack.i.h.bf16 %v2271_v51  ;;  %v2272_v55 = vunpack.i.l.bf16 %v2271_v51 }
 0xe22   :  { %v2142_v56 = vpack.c.bf16 %v2273_v52, %v2272_v55 }
 0xe24   :  { %2144 = vmatpush3.bf16.msk.msra.mxu1 %vm2486_vm8, %v2142_v56 }
 0xe25   :  { %2149 = vmatprep.subr.bf16.mxu1 %v2364_v48 }
 0xe27   :  { %2017 = vmatmul.mubr.msk.f32.vlgmr.msra.gmra.mrb[8].mxu1 %vm285_vm9, %v745_v57 }
 0xe28   :  { %2030 = vmatprep.mubr.msk.f32.mxu1 %vm2365_vm5, %v2360_v36 }
 0xe30   :  { %v836_v63 = vpop.permute.xlu1 %835 }
 0xe35   :  { %v841_v3 = vpop.permute.xlu1 %840 }
 0xefa   :  { %v829_v27 = vpop.f32.mrb[8].mxu1 }
 0xefb   :  { %v830_v0 = vadd.f32 %v829_v27, %v750_v61  ;;  %v2018_v1 = vpop.f32.mrb[9].mxu1 }
 0xefd   :  { %v833_v2 = vmax.f32 %v830_v0, 0.0 }
 0xeff   :  { %v838_v4 = vmul.f32 %v836_v63, %v833_v2  ;;  %v983_v63 = vld [vmem:[#allocation2 + $0x118] sm:$0xf] }
 0xf01   :  { %v2609_v10 = vadd.f32 %v841_v3, %v838_v4 }
 0xf03   :  { %v847_v11 = vadd.f32 %v845_v9, %v2609_v10 }
 0xf05   :  { %848 = vrot.lane.b32.xlu0 %v847_v11, %s2359_s0  ;;  %v857_v48 = vrot.slane %v847_v11, 4 }
 0xf09   :  { %858 = vrot.lane.b32.xlu0 %v857_v48, %s2362_s12  ;;  %v982_v48 = vld [vmem:[#allocation2 + $0xf8] sm:$0xf] }
 0xf77   :  { %v849_v12 = vpop.permute.xlu0 %848 }
 0xf78   :  { %v850_v36 = vsel %vm245_vm3, %v849_v12, %v847_v11  ;;  %v2372_v12 = vmov 4  }
 0xf79   :  { %851 = vrot.lane.b32.xlu1 %v850_v36, %s2359_s0 }
 0xf7b   :  { %v859_v24 = vpop.permute.xlu0 %858 }
 0xfeb   :  { %v852_v14 = vpop.permute.xlu1 %851 }
 0xfec   :  { %v853_v15 = vsel %vm245_vm3, %v852_v14, %v847_v11 }
 0xfed   :  { %v855_v16 = vmul.f32 %v853_v15, %v2466_v43  ;;  %v854_v23 = vmul.f32 %v2474_v49, %v853_v15 }
 0xfef   :  { %862 = vrot.lane.b32.xlu1 %v855_v16, %s2363_s13  ;;  %v864_v28 = vsel %vm270_vm6, %v854_v23, %v859_v24 }
 0xff3   :  { %80 = vperm.xlu1 %2282, %v2619_v21  }
 0xff7   :  { %2283 = vset.pattern.permute.xlu1 %v2357_v6 }
 0xff8   :  { %198 = vperm.xlu1 %2283, %v2619_v21  }
 0xffc   :  { %2285 = vset.pattern.permute.xlu1 %v2358_v8 }
 0xffd   :  { %218 = vperm.xlu1 %2285, %v2619_v21  }
0x1001   :  { %2286 = vset.pattern.permute.xlu1 %v2369_v58 }
0x1002   :  { %960 = vperm.xlu1 %2286, %v866_v22  }
0x1006   :  { %2292 = vset.pattern.permute.xlu1 %v2366_v53  ;;  %v865_v53 = vld [vmem:[#allocation2 + $0xf4] sm:$0xf] }
0x1061   :  { %v863_v26 = vpop.permute.xlu1 %862 }
0x1062   :  { %v2277_v29 = vpack.i.bf16 %v863_v26, %v864_v28 }
0x1064   :  { %2278 = vrot.lane.b32.xlu0 %v2277_v29, %s2368_s14 }
0x1068   :  { %869 = vperm.xlu0 %2274, %v866_v22  }
0x106c   :  { %2284 = vset.pattern.permute.xlu0 %v2367_v54 }
0x106d   :  { %955 = vperm.xlu0 %2284, %v866_v22  }
0x1072   :  { %v81_v33 = vpop.permute.xlu1 %80 }
0x1073   :  { %v178_v38 = vadd.f32 %v2576_v59, %v81_v33 }
0x1075   :  { %v184_v40 = vmax.f32 %v178_v38, 0.0 }
0x1077   :  { %v199_v34 = vpop.permute.xlu1 %198 }
0x1078   :  { %v204_v45 = vmul.f32 %v199_v34, %v184_v40 }
0x107c   :  { %v219_v39 = vpop.permute.xlu1 %218 }
0x107d   :  { %v2638_v47 = vadd.f32 %v219_v39, %v204_v45 }
0x1081   :  { %v961_v44 = vpop.permute.xlu1 %960 }
0x10d6   :  { %v2279_v8 = vpop.permute.xlu0 %2278 }
0x10d7   :  { %v2281_v30 = vunpack.i.h.bf16 %v2279_v8  ;;  %v2280_v31 = vunpack.i.l.bf16 %v2279_v8 }
0x10d9   :  { %v2146_v32 = vpack.c.bf16 %v2281_v30, %v2280_v31  ;;  %v1095_v31 = vld [vmem:[#allocation2 + $0x28] sm:$0xff] }
0x10db   :  { %2148 = vmatpush3.bf16.msk.msra.mxu0 %vm2486_vm8, %v2146_v32  ;;  %v1096_v32 = vld [vmem:[#allocation2 + $0x30] sm:$0xff] }
0x10dc   :  { %2154 = vmatprep.subr.bf16.mxu0 %v2590_v37 }
0x10de   :  { %2024 = vmatmul.mubr.msk.f32.vlgmr.msra.gmra.mrb[4].mxu0 %vm285_vm9, %v865_v53  ;;  %v1097_v53 = vld [vmem:[#allocation2 + $0x38] sm:$0xff] }
0x10df   :  { %2156 = vmatpush3.bf16.msra.mxu0 %v2590_v37 }
0x10e7   :  { %v870_v54 = vpop.permute.xlu0 %869 }
0x10ec   :  { %v956_v13 = vpop.permute.xlu0 %955 }
0x11b1   :  { %v949_v60 = vpop.f32.mrb[4].mxu0 }
0x11b2   :  { %v950_v41 = vadd.f32 %v949_v60, %v870_v54  ;;  %v2025_v42 = vpop.f32.mrb[5].mxu0 }
0x11b4   :  { %v953_v35 = vmax.f32 %v950_v41, 0.0 }
0x11b6   :  { %v958_v46 = vmul.f32 %v956_v13, %v953_v35 }
0x11b8   :  { %v2640_v51 = vadd.f32 %v961_v44, %v958_v46 }
0x11ba   :  { %v964_v37 = vadd.f32 %v2640_v51, %v2638_v47  ;;  %v1088_v24 = vrot.slane %v2640_v51, 4 }
0x11bc   :  { %965 = vrot.lane.b32.xlu0 %v964_v37, %s2359_s0  ;;  %v974_v59 = vrot.slane %v964_v37, 4  ;;  %v1092_v29 = vsel %vm270_vm6, %v2609_v10, %v1088_v24  ;;  %v1327_v24 = vld [vmem:[#allocation2 + $0x130] sm:$0xff] }
0x11c0   :  { %975 = vrot.lane.b32.xlu0 %v974_v59, %s2362_s12 }
0x122e   :  { %v966_v52 = vpop.permute.xlu0 %965 }
0x122f   :  { %v967_v55 = vsel %vm245_vm3, %v966_v52, %v964_v37 }
0x1230   :  { %968 = vrot.lane.b32.xlu1 %v967_v55, %s2359_s0 }
0x1232   :  { %v976_v0 = vpop.permute.xlu0 %975 }
0x12a2   :  { %v969_v56 = vpop.permute.xlu1 %968 }
0x12a3   :  { %v970_v57 = vsel %vm245_vm3, %v969_v56, %v964_v37 }
0x12a4   :  { %v972_v61 = vmul.f32 %v970_v57, %v2466_v43  ;;  %v971_v27 = vmul.f32 %v2474_v49, %v970_v57  ;;  %v2371_v49 = vmov 3  }
0x12a6   :  { %979 = vrot.lane.b32.xlu1 %v972_v61, %s2363_s13  ;;  %v981_v2 = vsel %vm270_vm6, %v971_v27, %v976_v0 }
0x12aa   :  { %986 = vperm.xlu1 %2292, %v983_v63  }
0x12ae   :  { %2293 = vset.pattern.permute.xlu1 %v2369_v58  ;;  %v1094_v58 = vld [vmem:[#allocation2 + $0x20] sm:$0xff] }
0x12af   :  { %1077 = vperm.xlu1 %2293, %v983_v63   ;;  %2041 = vmatprep.mubr.msk.f32.mxu0 %vm83_vm0, %v1094_v58 }
0x12b3   :  { %2295 = vset.pattern.permute.xlu1 %v2371_v49 }
0x12b4   :  { %1103 = vperm.xlu1 %2295, %v2506_v25  }
0x12b8   :  { %1107 = vperm.xlu1 %2295, %v2563_v50  }
0x12bc   :  { %2296 = vset.pattern.permute.xlu1 %v2372_v12 }
0x12bd   :  { %1216 = vperm.xlu1 %2296, %v2418_v7  }
0x12c1   :  { %2298 = vset.pattern.permute.xlu1 %v2373_v62 }
0x12c2   :  { %1236 = vperm.xlu1 %2298, %v2418_v7  }
0x12c6   :  { %1240 = vperm.xlu1 %2298, %v2506_v25  }
0x12ca   :  { %2299 = vset.pattern.permute.xlu1 %v2372_v12 }
0x12cb   :  { %1228 = vperm.xlu1 %2299, %v2619_v21  }
0x12cf   :  { %2301 = vset.pattern.permute.xlu1 %v2373_v62 }
0x12d0   :  { %1248 = vperm.xlu1 %2301, %v2619_v21  }
0x12d4   :  { %2303 = vset.pattern.permute.xlu1 %v2356_v5 }
0x1318   :  { %v980_v1 = vpop.permute.xlu1 %979 }
0x1319   :  { %v2287_v3 = vpack.i.bf16 %v980_v1, %v981_v2 }
0x131b   :  { %2288 = vrot.lane.b32.xlu0 %v2287_v3, %s2368_s14 }
0x131f   :  { %1072 = vperm.xlu0 %2284, %v983_v63  }
0x1323   :  { %2294 = vset.pattern.permute.xlu0 %v2371_v49 }
0x1324   :  { %1099 = vperm.xlu0 %2294, %v2418_v7  }
0x1328   :  { %1111 = vperm.xlu0 %2294, %v2619_v21  }
0x1329   :  { %v987_v36 = vpop.permute.xlu1 %986 }
0x132c   :  { %2297 = vset.pattern.permute.xlu0 %v2372_v12 }
0x132d   :  { %1220 = vperm.xlu0 %2297, %v2506_v25  }
0x132e   :  { %v1078_v23 = vpop.permute.xlu1 %1077 }
0x1331   :  { %1224 = vperm.xlu0 %2297, %v2563_v50  }
0x1333   :  { %v1104_v33 = vpop.permute.xlu1 %1103 }
0x1335   :  { %2300 = vset.pattern.permute.xlu0 %v2373_v62 }
0x1336   :  { %1244 = vperm.xlu0 %2300, %v2563_v50  }
0x1337   :  { %v1108_v34 = vpop.permute.xlu1 %1107 }
0x133a   :  { %2302 = vset.pattern.permute.xlu0 %v2356_v5 }
0x133c   :  { %v1217_v38 = vpop.permute.xlu1 %1216 }
0x1341   :  { %v1237_v10 = vpop.permute.xlu1 %1236 }
0x1345   :  { %v1241_v60 = vpop.permute.xlu1 %1240 }
0x134a   :  { %v1229_v44 = vpop.permute.xlu1 %1228 }
0x134f   :  { %v1249_v0 = vpop.permute.xlu1 %1248 }
0x138d   :  { %v2289_v4 = vpop.permute.xlu0 %2288 }
0x138e   :  { %v2291_v9 = vunpack.i.h.bf16 %v2289_v4  ;;  %v2290_v43 = vunpack.i.l.bf16 %v2289_v4 }
0x1390   :  { %v2150_v11 = vpack.c.bf16 %v2291_v9, %v2290_v43 }
0x1392   :  { %2152 = vmatpush3.bf16.msk.msra.mxu1 %vm2486_vm8, %v2150_v11 }
0x1395   :  { %2031 = vmatmul.mubr.msk.f32.vlgmr.msra.gmra.mrb[10].mxu1 %vm285_vm9, %v982_v48 }
0x139e   :  { %v1073_v22 = vpop.permute.xlu0 %1072 }
0x13a3   :  { %v1100_v54 = vpop.permute.xlu0 %1099 }
0x13a7   :  { %v1112_v39 = vpop.permute.xlu0 %1111 }
0x13ac   :  { %v1221_v40 = vpop.permute.xlu0 %1220 }
0x13b0   :  { %v1225_v52 = vpop.permute.xlu0 %1224 }
0x13b5   :  { %v1245_v2 = vpop.permute.xlu0 %1244 }
0x1468   :  { %v1066_v14 = vpop.f32.mrb[10].mxu1 }
0x1469   :  { %v1067_v15 = vadd.f32 %v1066_v14, %v987_v36  ;;  %v2032_v16 = vpop.f32.mrb[11].mxu1 }
0x146b   :  { %v1070_v7 = vmax.f32 %v1067_v15, 0.0 }
0x146d   :  { %v1075_v26 = vmul.f32 %v1073_v22, %v1070_v7  ;;  %v1309_v22 = vld [vmem:[#allocation2 + $0x40] sm:$0xff] }
0x146e   :  { %2055 = vmatprep.mubr.msk.f32.mxu1 %vm83_vm0, %v1309_v22  ;;  %v1322_v22 = vld [vmem:[#allocation2 + $0xa8] sm:$0xff] }
0x146f   :  { %v1080_v28 = vadd.f32 %v1078_v23, %v1075_v26  ;;  %v1326_v23 = vld [vmem:[#allocation2 + $0x128] sm:$0xff]  ;;  %v1325_v26 = vld [vmem:[#allocation2 + $0x120] sm:$0xff] }
0x1471   :  { %v1093_v8 = vsel %vm270_vm6, %v1080_v28, %v2638_v47  ;;  %v1334_v28 = vld [vmem:[#allocation2 + $0x168] sm:$0xff] }
0x1472   :  { %v2157_v30 = vpack.c.bf16 %v1093_v8, %v1092_v29  ;;  %v1328_v29 = vld [vmem:[#allocation2 + $0x138] sm:$0xff] }
0x1473   :  { %v1336_v8 = vld [vmem:[#allocation2 + $0x178] sm:$0xff] }
0x1474   :  { %2158 = vmatprep.subr.bf16.mxu0 %v2157_v30 }
0x1475   :  { %2160 = vmatpush3.bf16.msra.mxu0 %v2157_v30  ;;  %v1329_v30 = vld [vmem:[#allocation2 + $0x140] sm:$0xff] }
0x1478   :  { %2042 = vmatmul.mubr.msk.f32.vlgmr.msra.gmra.mrb[6].mxu0 %vm83_vm0, %v1095_v31  ;;  %v1338_v31 = vld [vmem:[#allocation2 + $0x188] sm:$0xff] }
0x1479   :  { %2044 = vmatprep.mubr.msk.f32.mxu0 %vm83_vm0, %v1096_v32  ;;  %v1330_v32 = vld [vmem:[#allocation2 + $0x148] sm:$0xff] }
0x147c   :  { %2045 = vmatmul.mubr.msk.f32.gmra.mrb[8].mxu0 %vm83_vm0, %v1097_v53  ;;  %v1340_v53 = vld [vmem:[#allocation2 + $0x198] sm:$0xff] }
0x154b   :  { %v2043_v41 = vpop.f32.mrb[6].mxu0 }
0x154c   :  { %v1198_v42 = vadd.f32 %v2043_v41, %v1104_v33  ;;  %v1192_v13 = vpop.f32.mrb[7].mxu0  ;;  %v1331_v33 = vld [vmem:[#allocation2 + $0x150] sm:$0xff] }
0x154d   :  { %v1193_v35 = vadd.f32 %v1192_v13, %v1100_v54  ;;  %v1335_v54 = vld [vmem:[#allocation2 + $0x170] sm:$0xff] }
0x154e   :  { %v1212_v45 = vmax.f32 %v1198_v42, 0.0 }
0x154f   :  { %v1211_v46 = vmax.f32 %v1193_v35, 0.0  ;;  %v2046_v47 = vpop.f32.mrb[8].mxu0 }
0x1550   :  { %v1232_v51 = vmul.f32 %v1221_v40, %v1212_v45  ;;  %v1208_v37 = vadd.f32 %v2046_v47, %v1112_v39  ;;  %v1202_v59 = vpop.f32.mrb[9].mxu0  ;;  %v1339_v39 = vld [vmem:[#allocation2 + $0x190] sm:$0xff] }
0x1551   :  { %v1231_v55 = vmul.f32 %v1217_v38, %v1211_v46  ;;  %v1203_v56 = vadd.f32 %v1202_v59, %v1108_v34  ;;  %v1332_v34 = vld [vmem:[#allocation2 + $0x158] sm:$0xff]  ;;  %v1333_v38 = vld [vmem:[#allocation2 + $0x160] sm:$0xff] }
0x1552   :  { %v2681_v57 = vadd.f32 %v1241_v60, %v1232_v51  ;;  %v1214_v61 = vmax.f32 %v1208_v37, 0.0 }
0x1553   :  { %v2683_v63 = vadd.f32 %v1237_v10, %v1231_v55  ;;  %v1213_v27 = vmax.f32 %v1203_v56, 0.0  ;;  %v1337_v10 = vld [vmem:[#allocation2 + $0x180] sm:$0xff] }
0x1554   :  { %v1234_v1 = vmul.f32 %v1229_v44, %v1214_v61  ;;  %1278 = vrot.lane.b32.xlu0 %v2681_v57, %s2374_s15  ;;  %v1258_v43 = vsel %vm50_vm1, %v2681_v57, 0.0 }
0x1555   :  { %v1233_v3 = vmul.f32 %v1225_v52, %v1213_v27  ;;  %1276 = vrot.lane.b32.xlu1 %v2683_v63, %s2374_s15  ;;  %v1255_v48 = vsel %vm50_vm1, %v2683_v63, 0.0 }
0x1556   :  { %v2689_v4 = vadd.f32 %v1249_v0, %v1234_v1 }
0x1557   :  { %v2691_v9 = vadd.f32 %v1245_v2, %v1233_v3 }
0x1558   :  { %1282 = vrot.lane.b32.xlu0 %v2689_v4, %s2374_s15  ;;  %v1264_v58 = vsel %vm50_vm1, %v2689_v4, 0.0 }
0x1559   :  { %1280 = vrot.lane.b32.xlu1 %v2691_v9, %s2374_s15  ;;  %v1261_v11 = vsel %vm50_vm1, %v2691_v9, 0.0 }
0x1577   :  { %1259 = vadd.xlane.f32.xlu0 %v1258_v43  ;;  %v1310_v43 = vld [vmem:[#allocation2 + $0x48] sm:$0xff] }
0x157b   :  { %1262 = vadd.xlane.f32.xlu0 %v1261_v11  ;;  %v1311_v11 = vld [vmem:[#allocation2 + $0x50] sm:$0xff] }
0x157d   :  { %1256 = vadd.xlane.f32.xlu1 %v1255_v48  ;;  %v1312_v48 = vld [vmem:[#allocation2 + $0x58] sm:$0xff] }
0x1581   :  { %1265 = vadd.xlane.f32.xlu1 %v1264_v58  ;;  %v1313_v58 = vld [vmem:[#allocation2 + $0x60] sm:$0xff] }
0x15c6   :  { %v1279_v49 = vpop.permute.xlu0 %1278 }
0x15c7   :  { %v1291_v12 = vsel %vm50_vm1, %v1279_v49, 0.0  ;;  %v1277_v62 = vpop.permute.xlu1 %1276  ;;  %v1314_v49 = vld [vmem:[#allocation2 + $0x68] sm:$0xff] }
0x15c8   :  { %1292 = vadd.xlane.f32.xlu1 %v1291_v12  ;;  %v1288_v36 = vsel %vm50_vm1, %v1277_v62, 0.0  ;;  %v1315_v12 = vld [vmem:[#allocation2 + $0x70] sm:$0xff]  ;;  %v1316_v62 = vld [vmem:[#allocation2 + $0x78] sm:$0xff] }
0x15c9   :  { %1289 = vadd.xlane.f32.xlu0 %v1288_v36  ;;  %v1317_v36 = vld [vmem:[#allocation2 + $0x80] sm:$0xff] }
0x15ca   :  { %v1283_v14 = vpop.permute.xlu0 %1282 }
0x15cb   :  { %v1297_v15 = vsel %vm50_vm1, %v1283_v14, 0.0  ;;  %v1281_v16 = vpop.permute.xlu1 %1280  ;;  %v1318_v14 = vld [vmem:[#allocation2 + $0x88] sm:$0xff] }
0x15cc   :  { %1298 = vadd.xlane.f32.xlu1 %v1297_v15  ;;  %v1294_v7 = vsel %vm50_vm1, %v1281_v16, 0.0  ;;  %v1319_v15 = vld [vmem:[#allocation2 + $0x90] sm:$0xff]  ;;  %v1320_v16 = vld [vmem:[#allocation2 + $0x98] sm:$0xff] }
0x15cd   :  { %1295 = vadd.xlane.f32.xlu0 %v1294_v7  ;;  %v1321_v7 = vld [vmem:[#allocation2 + $0xa0] sm:$0xff] }
0x15dd   :  { %1348 = vperm.xlu1 %2303, %v1326_v23   ;;  %v1323_v23 = vld [vmem:[#allocation2 + $0xb0] sm:$0xff] }
0x15e1   :  { %1353 = vperm.xlu1 %2303, %v1327_v24   ;;  %v1324_v24 = vld [vmem:[#allocation2 + $0xb8] sm:$0xff] }
0x15e3   :  { %1343 = vperm.xlu0 %2302, %v1325_v26   ;;  %v1630_v26 = vld [vmem:[#allocation2 + $0xc0] sm:$0xff] }
0x15e4   :  { %2111 = vmatprep.mubr.f32.mxu0 %v1630_v26 }
0x15e5   :  { %1358 = vperm.xlu1 %2303, %v1328_v29   ;;  %v2327_v29 = vld [vmem:[#allocation2 + $0x100] sm:$0xff] }
0x15e7   :  { %1388 = vperm.xlu0 %2302, %v1334_v28   ;;  %v2375_v28 = vmov 6  }
0x15e9   :  { %1363 = vperm.xlu1 %2303, %v1329_v30  }
0x15eb   :  { %1398 = vperm.xlu0 %2302, %v1336_v8  }
0x15ed   :  { %1368 = vperm.xlu1 %2303, %v1330_v32  }
0x15ef   :  { %1408 = vperm.xlu0 %2302, %v1338_v31  }
0x15f1   :  { %1373 = vperm.xlu1 %2303, %v1331_v33  }
0x15f3   :  { %1418 = vperm.xlu0 %2302, %v1340_v53  }
0x15f5   :  { %1378 = vperm.xlu1 %2303, %v1332_v34  }
0x15f7   :  { %2305 = vset.pattern.permute.xlu0 %v2375_v28 }
0x15f8   :  { %1639 = vperm.xlu0 %2305, %v2506_v25  }
0x15f9   :  { %1383 = vperm.xlu1 %2303, %v1333_v38  }
0x15fc   :  { %2307 = vset.pattern.permute.xlu0 %v2357_v6 }
0x15fd   :  { %1393 = vperm.xlu1 %2303, %v1335_v54  }
0x1601   :  { %1403 = vperm.xlu1 %2303, %v1337_v10  }
0x1604   :  { %v1260_v40 = vpop.xlane.xlu0 %1259 }
0x1605   :  { %1413 = vperm.xlu1 %2303, %v1339_v39   ;;  %v1269_v35 = vmul.f32 0.0625, %v1260_v40 }
0x1608   :  { %v1263_v42 = vpop.xlane.xlu0 %1262 }
0x1609   :  { %v1270_v27 = vmul.f32 0.0625, %v1263_v42  ;;  %2304 = vset.pattern.permute.xlu1 %v2375_v28 }
0x160a   :  { %v1257_v60 = vpop.xlane.xlu1 %1256  ;;  %1635 = vperm.xlu1 %2304, %v2327_v29  }
0x160b   :  { %v1268_v46 = vmul.f32 0.0625, %v1257_v60 }
0x160e   :  { %v1266_v41 = vpop.xlane.xlu1 %1265  ;;  %1643 = vperm.xlu1 %2304, %v2563_v50  }
0x160f   :  { %v1271_v52 = vmul.f32 0.0625, %v1266_v41 }
0x1612   :  { %1647 = vperm.xlu1 %2304, %v2619_v21  }
0x1616   :  { %2306 = vset.pattern.permute.xlu1 %v2357_v6 }
0x1655   :  { %v1293_v13 = vpop.xlane.xlu1 %1292 }
0x1656   :  { %v1301_v44 = vmul.f32 0.0625, %v1293_v13  ;;  %v1290_v45 = vpop.xlane.xlu0 %1289 }
0x1657   :  { %v1300_v47 = vmul.f32 0.0625, %v1290_v45 }
0x1658   :  { %v1306_v51 = vsel %vm1304_vm10, %v1269_v35, %v1301_v44 }
0x1659   :  { %v1299_v37 = vpop.xlane.xlu1 %1298  ;;  %v1305_v59 = vsel %vm1304_vm10, %v1268_v46, %v1300_v47 }
0x165a   :  { %v1303_v55 = vmul.f32 0.0625, %v1299_v37  ;;  %v1296_v56 = vpop.xlane.xlu0 %1295  ;;  %v2161_v61 = vpack.c.bf16 %v1306_v51, %v1305_v59 }
0x165b   :  { %v1302_v0 = vmul.f32 0.0625, %v1296_v56 }
0x165c   :  { %2162 = vmatprep.subr.bf16.mxu1 %v2161_v61  ;;  %v1308_v1 = vsel %vm1304_vm10, %v1271_v52, %v1303_v55 }
0x165d   :  { %2164 = vmatpush3.bf16.msra.mxu1 %v2161_v61  ;;  %v1307_v2 = vsel %vm1304_vm10, %v1270_v27, %v1302_v0  ;;  %v1349_v8 = vpop.permute.xlu1 %1348 }
0x165e   :  { %v2165_v3 = vpack.c.bf16 %v1308_v1, %v1307_v2 }
0x1660   :  { %2166 = vmatprep.subr.bf16.mxu1 %v2165_v3 }
0x1661   :  { %2168 = vmatpush3.bf16.msra.mxu1 %v2165_v3  ;;  %v1354_v30 = vpop.permute.xlu1 %1353 }
0x1662   :  { %v1344_v38 = vpop.permute.xlu0 %1343 }
0x1664   :  { %2056 = vmatmul.mubr.msk.f32.vlgmr.msra.gmra.mrb[12].mxu1 %vm83_vm0, %v1310_v43 }
0x1665   :  { %2058 = vmatprep.mubr.msk.f32.mxu1 %vm83_vm0, %v1311_v11  ;;  %v1359_v31 = vpop.permute.xlu1 %1358 }
0x1666   :  { %v1389_v51 = vpop.permute.xlu0 %1388 }
0x1668   :  { %2059 = vmatmul.mubr.msk.f32.gmra.mrb[14].mxu1 %vm83_vm0, %v1312_v48 }
0x1669   :  { %2061 = vmatprep.mubr.msk.f32.mxu1 %vm83_vm0, %v1313_v58  ;;  %v1364_v32 = vpop.permute.xlu1 %1363 }
0x166a   :  { %v1399_v43 = vpop.permute.xlu0 %1398 }
0x166c   :  { %2062 = vmatmul.mubr.msk.f32.gmra.mrb[16].mxu1 %vm83_vm0, %v1314_v49 }
0x166d   :  { %2064 = vmatprep.mubr.msk.f32.mxu1 %vm83_vm0, %v1315_v12  ;;  %v1369_v53 = vpop.permute.xlu1 %1368 }
0x1670   :  { %2065 = vmatmul.mubr.msk.f32.gmra.mrb[18].mxu1 %vm83_vm0, %v1316_v62 }
0x1671   :  { %2067 = vmatprep.mubr.msk.f32.mxu1 %vm83_vm0, %v1317_v36  ;;  %v1374_v33 = vpop.permute.xlu1 %1373 }
0x1674   :  { %2068 = vmatmul.mubr.msk.f32.gmra.mrb[20].mxu1 %vm83_vm0, %v1318_v14 }
0x1675   :  { %2070 = vmatprep.mubr.msk.f32.mxu1 %vm83_vm0, %v1319_v15  ;;  %v1379_v40 = vpop.permute.xlu1 %1378 }
0x1678   :  { %2071 = vmatmul.mubr.msk.f32.gmra.mrb[22].mxu1 %vm83_vm0, %v1320_v16 }
0x1679   :  { %2073 = vmatprep.mubr.msk.f32.mxu1 %vm83_vm0, %v1321_v7  ;;  %v1384_v52 = vpop.permute.xlu1 %1383 }
0x167c   :  { %2074 = vmatmul.mubr.msk.f32.gmra.mrb[24].mxu1 %vm83_vm0, %v1322_v22 }
0x167d   :  { %2076 = vmatprep.mubr.msk.f32.mxu1 %vm83_vm0, %v1323_v23  ;;  %v1394_v58 = vpop.permute.xlu1 %1393  ;;  %v1409_v23 = vpop.permute.xlu0 %1408 }
0x1680   :  { %2077 = vmatmul.mubr.msk.f32.gmra.mrb[26].mxu1 %vm83_vm0, %v1324_v24 }
0x1681   :  { %v1404_v28 = vpop.permute.xlu1 %1403 }
0x1737   :  { %v2057_v34 = vpop.f32.mrb[12].mxu1 }
0x1738   :  { %v1541_v54 = vadd.f32 %v2057_v34, %v1349_v8  ;;  %v1535_v10 = vpop.f32.mrb[13].mxu1 }
0x1739   :  { %v1536_v39 = vadd.f32 %v1535_v10, %v1344_v38  ;;  %v1419_v38 = vpop.permute.xlu0 %1418 }
0x173a   :  { %v1615_v25 = vmax.f32 %v1541_v54, 0.0 }
0x173b   :  { %v1614_v60 = vmax.f32 %v1536_v39, 0.0  ;;  %v2060_v50 = vpop.f32.mrb[14].mxu1  ;;  %v1414_v39 = vpop.permute.xlu1 %1413 }
0x173c   :  { %v1551_v41 = vadd.f32 %v2060_v50, %v1359_v31  ;;  %v1545_v42 = vpop.f32.mrb[15].mxu1 }
0x173d   :  { %v2169_v21 = vpack.c.bf16 %v1615_v25, %v1614_v60  ;;  %v1546_v13 = vadd.f32 %v1545_v42, %v1354_v30 }
0x173e   :  { %v1617_v35 = vmax.f32 %v1551_v41, 0.0 }
0x173f   :  { %v1616_v44 = vmax.f32 %v1546_v13, 0.0  ;;  %v2063_v45 = vpop.f32.mrb[16].mxu1  ;;  %2170 = vmatprep.subr.bf16.mxu0 %v2169_v21  ;;  %v1631_v13 = vld [vmem:[#allocation2 + $0xc8] sm:$0xff] }
0x1740   :  { %v1561_v46 = vadd.f32 %v2063_v45, %v1369_v53  ;;  %v1555_v47 = vpop.f32.mrb[17].mxu1  ;;  %2172 = vmatpush3.bf16.msra.mxu0 %v2169_v21  ;;  %v1636_v45 = vpop.permute.xlu1 %1635 }
0x1741   :  { %v2173_v37 = vpack.c.bf16 %v1617_v35, %v1616_v44  ;;  %v1556_v59 = vadd.f32 %v1555_v47, %v1364_v32  ;;  %v1632_v35 = vld [vmem:[#allocation2 + $0xd0] sm:$0xff]  ;;  %v1633_v44 = vld [vmem:[#allocation2 + $0xd8] sm:$0xff]  ;;  %v1640_v47 = vpop.permute.xlu0 %1639 }
0x1742   :  { %v1619_v55 = vmax.f32 %v1561_v46, 0.0 }
0x1743   :  { %v1618_v56 = vmax.f32 %v1556_v59, 0.0  ;;  %v2066_v61 = vpop.f32.mrb[18].mxu1  ;;  %2174 = vmatprep.subr.bf16.mxu0 %v2173_v37 }
0x1744   :  { %v1571_v27 = vadd.f32 %v2066_v61, %v1379_v40  ;;  %v1565_v0 = vpop.f32.mrb[19].mxu1  ;;  %2176 = vmatpush3.bf16.msra.mxu0 %v2173_v37  ;;  %v1644_v46 = vpop.permute.xlu1 %1643 }
0x1745   :  { %v2177_v1 = vpack.c.bf16 %v1619_v55, %v1618_v56  ;;  %v1566_v2 = vadd.f32 %v1565_v0, %v1374_v33 }
0x1746   :  { %v1621_v3 = vmax.f32 %v1571_v27, 0.0 }
0x1747   :  { %v1620_v11 = vmax.f32 %v1566_v2, 0.0  ;;  %v2069_v48 = vpop.f32.mrb[20].mxu1  ;;  %2178 = vmatprep.subr.bf16.mxu0 %v2177_v1 }
0x1748   :  { %v1581_v49 = vadd.f32 %v2069_v48, %v1389_v51  ;;  %v1575_v12 = vpop.f32.mrb[21].mxu1  ;;  %2180 = vmatpush3.bf16.msra.mxu0 %v2177_v1  ;;  %v1648_v61 = vpop.permute.xlu1 %1647 }
0x1749   :  { %v2181_v62 = vpack.c.bf16 %v1621_v3, %v1620_v11  ;;  %v1576_v36 = vadd.f32 %v1575_v12, %v1384_v52 }
0x174a   :  { %v1623_v14 = vmax.f32 %v1581_v49, 0.0 }
0x174b   :  { %v1622_v15 = vmax.f32 %v1576_v36, 0.0  ;;  %v2072_v16 = vpop.f32.mrb[22].mxu1  ;;  %2182 = vmatprep.subr.bf16.mxu0 %v2181_v62 }
0x174c   :  { %v1591_v7 = vadd.f32 %v2072_v16, %v1399_v43  ;;  %v1585_v22 = vpop.f32.mrb[23].mxu1  ;;  %2184 = vmatpush3.bf16.msra.mxu0 %v2181_v62 }
0x174d   :  { %v2185_v24 = vpack.c.bf16 %v1623_v14, %v1622_v15  ;;  %v1586_v26 = vadd.f32 %v1585_v22, %v1394_v58 }
0x174e   :  { %v1625_v29 = vmax.f32 %v1591_v7, 0.0 }
0x174f   :  { %v1624_v8 = vmax.f32 %v1586_v26, 0.0  ;;  %v2075_v30 = vpop.f32.mrb[24].mxu1  ;;  %2186 = vmatprep.subr.bf16.mxu0 %v2185_v24 }
0x1750   :  { %v1601_v31 = vadd.f32 %v2075_v30, %v1409_v23  ;;  %v1595_v32 = vpop.f32.mrb[25].mxu1  ;;  %2188 = vmatpush3.bf16.msra.mxu0 %v2185_v24 }
0x1751   :  { %v2189_v53 = vpack.c.bf16 %v1625_v29, %v1624_v8  ;;  %v1596_v33 = vadd.f32 %v1595_v32, %v1404_v28 }
0x1752   :  { %v1627_v34 = vmax.f32 %v1601_v31, 0.0 }
0x1753   :  { %v1626_v54 = vmax.f32 %v1596_v33, 0.0  ;;  %v2078_v10 = vpop.f32.mrb[26].mxu1  ;;  %2190 = vmatprep.subr.bf16.mxu0 %v2189_v53 }
0x1754   :  { %v1611_v25 = vadd.f32 %v2078_v10, %v1419_v38  ;;  %v1605_v60 = vpop.f32.mrb[27].mxu1  ;;  %2192 = vmatpush3.bf16.msra.mxu0 %v2189_v53 }
0x1755   :  { %v2193_v50 = vpack.c.bf16 %v1627_v34, %v1626_v54  ;;  %v1606_v40 = vadd.f32 %v1605_v60, %v1414_v39 }
0x1756   :  { %v1629_v41 = vmax.f32 %v1611_v25, 0.0 }
0x1757   :  { %v1628_v42 = vmax.f32 %v1606_v40, 0.0  ;;  %2194 = vmatprep.subr.bf16.mxu0 %v2193_v50 }
0x1758   :  { %2196 = vmatpush3.bf16.msra.mxu0 %v2193_v50 }
0x1759   :  { %v2197_v21 = vpack.c.bf16 %v1629_v41, %v1628_v42 }
0x175b   :  { %2198 = vmatprep.subr.bf16.mxu0 %v2197_v21 }
0x175c   :  { %2200 = vmatpush3.bf16.msra.mxu0 %v2197_v21 }
0x175f   :  { %2112 = vmatmul.mubr.f32.vlgmr.msra.gmra.mrb[10].mxu0 %v1631_v13 }
0x1760   :  { %2114 = vmatprep.mubr.f32.mxu0 %v1632_v35 }
0x1763   :  { %2115 = vmatmul.mubr.f32.gmra.mrb[12].mxu0 %v1633_v44 }
0x1832   :  { %v2113_v51 = vpop.f32.mrb[10].mxu0 }
0x1833   :  { %v1722_v37 = vadd.f32 %v2113_v51, %v1640_v47  ;;  %v1716_v59 = vpop.f32.mrb[11].mxu0 }
0x1834   :  { %v1717_v52 = vadd.f32 %v1716_v59, %v1636_v45 }
0x1835   :  { %v1886_v55 = vmul.f32 -1.442695, %v1722_v37 }
0x1836   :  { %v1885_v56 = vmul.f32 -1.442695, %v1717_v52  ;;  %v2116_v27 = vpop.f32.mrb[12].mxu0 }
0x1837   :  { %2311 = vpow2.f32 %v1886_v55  ;;  %v1732_v0 = vadd.f32 %v2116_v27, %v1648_v61  ;;  %v1726_v1 = vpop.f32.mrb[13].mxu0 }
0x1838   :  { %2313 = vpow2.f32 %v1885_v56  ;;  %v1727_v2 = vadd.f32 %v1726_v1, %v1644_v46 }
0x1839   :  { %v1888_v3 = vmul.f32 -1.442695, %v1732_v0 }
0x183a   :  { %v1887_v43 = vmul.f32 -1.442695, %v1727_v2 }
0x183b   :  { %2315 = vpow2.f32 %v1888_v3 }
0x183c   :  { %2317 = vpow2.f32 %v1887_v43 }
0x1841   :  { %v2312_v11 = vpop.eup %2311 }
0x1842   :  { %v2314_v48 = vpop.eup %2313  ;;  %v1748_v58 = vadd.f32 1.0, %v2312_v11 }
0x1843   :  { %v1747_v49 = vadd.f32 1.0, %v2314_v48 }
0x1844   :  { %2319 = vrcp.f32 %v1748_v58 }
0x1845   :  { %v2316_v12 = vpop.eup %2315  ;;  %2321 = vrcp.f32 %v1747_v49 }
0x1846   :  { %v2318_v62 = vpop.eup %2317  ;;  %v1750_v36 = vadd.f32 1.0, %v2316_v12 }
0x1847   :  { %v1749_v14 = vadd.f32 1.0, %v2318_v62 }
0x1848   :  { %2323 = vrcp.f32 %v1750_v36 }
0x1849   :  { %2325 = vrcp.f32 %v1749_v14 }
0x184e   :  { %v2320_v15 = vpop.eup %2319 }
0x184f   :  { %v2322_v16 = vpop.eup %2321  ;;  %1796 = vperm.xlu1 %2306, %v2320_v15  }
0x1850   :  { %1792 = vperm.xlu0 %2307, %v2322_v16  }
0x1852   :  { %v2324_v7 = vpop.eup %2323 }
0x1853   :  { %v2326_v22 = vpop.eup %2325 }
0x1854   :  { %1800 = vperm.xlu1 %2306, %v2326_v22   ;;  %1804 = vperm.xlu0 %2307, %v2324_v7  }
0x1858   :  { %2308 = vset.pattern.permute.xlu1 %v2356_v5  ;;  %2309 = vset.pattern.permute.xlu0 %v2356_v5 }
0x1859   :  { %1761 = vperm.xlu1 %2308, %v2322_v16   ;;  %1766 = vperm.xlu0 %2309, %v2320_v15  }
0x185d   :  { %1771 = vperm.xlu1 %2308, %v2326_v22   ;;  %2310 = vset.pattern.permute.xlu0 %v2357_v6 }
0x1861   :  { %1776 = vperm.xlu1 %2308, %v2324_v7  }
0x18ce   :  { %v1797_v23 = vpop.permute.xlu1 %1796 }
0x18cf   :  { %v1808_v24 = vmul.f32 %v1797_v23, %v2681_v57  ;;  %v1793_v26 = vpop.permute.xlu0 %1792 }
0x18d0   :  { %v1807_v28 = vmul.f32 %v1793_v26, %v2683_v63 }
0x18d1   :  { %v1812_v29 = vadd.f32 %v1808_v24, %v2446_v20 }
0x18d2   :  { %v1811_v8 = vadd.f32 %v1807_v28, %v2440_v18 }
0x18d3   :  { %v1801_v30 = vpop.permute.xlu1 %1800  ;;  %1821 = vrot.lane.b32.xlu1 %v1812_v29, %s2374_s15  ;;  %v1805_v5 = vpop.permute.xlu0 %1804 }
0x18d4   :  { %v1809_v31 = vmul.f32 %v1801_v30, %v2691_v9  ;;  %v1810_v32 = vmul.f32 %v1805_v5, %v2689_v4  ;;  %1819 = vrot.lane.b32.xlu0 %v1811_v8, %s2374_s15 }
0x18d6   :  { %v1813_v6 = vadd.f32 %v1809_v31, %v2437_v17  ;;  %v1814_v53 = vadd.f32 %v1810_v32, %v2443_v19 }
0x18d8   :  { %v1762_v33 = vpop.permute.xlu1 %1761  ;;  %1823 = vrot.lane.b32.xlu0 %v1813_v6, %s2374_s15  ;;  %1825 = vrot.lane.b32.xlu1 %v1814_v53, %s2374_s15  ;;  %v1767_v34 = vpop.permute.xlu0 %1766 }
0x18d9   :  { %v1779_v38 = vmul.f32 %v1762_v33, %v2683_v63  ;;  %v1780_v54 = vmul.f32 %v1767_v34, %v2681_v57 }
0x18db   :  { %v1783_v10 = vadd.f32 %v1779_v38, %v2440_v18  ;;  %v1784_v39 = vadd.f32 %v1780_v54, %v2446_v20 }
0x18dc   :  { %v1772_v25 = vpop.permute.xlu1 %1771 }
0x18dd   :  { %1787 = vst.msk [vmem:[%s2791_s2] sm:$0xff] %vm50_vm1, %v1783_v10  ;;  %1788 = vst.msk [vmem:[%s2791_s2 + $0x8] sm:$0xff] %vm50_vm1, %v1784_v39  ;;  %v1781_v60 = vmul.f32 %v1772_v25, %v2691_v9 }
0x18df   :  { %v1785_v63 = vadd.f32 %v1781_v60, %v2437_v17 }
0x18e0   :  { %v1777_v57 = vpop.permute.xlu1 %1776 }
0x18e1   :  { %1789 = vst.msk [vmem:[%s2791_s2 + $0x10] sm:$0xff] %vm50_vm1, %v1785_v63  ;;  %v1782_v18 = vmul.f32 %v1777_v57, %v2689_v4 }
0x18e3   :  { %v1786_v20 = vadd.f32 %v1782_v18, %v2443_v19 }
0x18e5   :  { %1790 = vst.msk [vmem:[%s2791_s2 + $0x18] sm:$0xff] %vm50_vm1, %v1786_v20 }
0x1945   :  { %v1822_v50 = vpop.permute.xlu1 %1821 }
0x1946   :  { %1890 = vst.msk [vmem:[%s2791_s2 + $0x28] sm:$0xff] %vm50_vm1, %v1822_v50  ;;  %v1820_v17 = vpop.permute.xlu0 %1819 }
0x1947   :  { %1889 = vst.msk [vmem:[%s2791_s2 + $0x20] sm:$0xff] %vm50_vm1, %v1820_v17 }
0x194a   :  { %v1826_v4 = vpop.permute.xlu1 %1825  ;;  %v1824_v9 = vpop.permute.xlu0 %1823 }
0x194b   :  { %1892 = vst.msk [vmem:[%s2791_s2 + $0x38] sm:$0xff] %vm50_vm1, %v1826_v4  ;;  %1891 = vst.msk [vmem:[%s2791_s2 + $0x30] sm:$0xff] %vm50_vm1, %v1824_v9 }
0x194c   :  { %1840 = vsyncpa [#allocation3], 1 }

</bundles_post_ra>
